<compile_context>
chip_gen: v7x
topology: tpu7x:2x2x1
jax: 0.10.0
libtpu: 0.0.40
codegen_flags: <defaults>
</compile_context>

<pallas_src>
import functools

import jax
import jax.numpy as jnp
from jax import lax
from jax.experimental import pallas as pl
from jax.experimental.pallas import tpu as pltpu


def _softmax_over_keys(x, approx_recip):
    """Softmax over dim=-2 of a (..., C, C) f32 score tile."""
    m = jnp.max(x, axis=-2, keepdims=True)
    e = jnp.exp(x - m)
    s = jnp.sum(e, axis=-2, keepdims=True)
    if approx_recip:
        return e * pl.reciprocal(s, approx=True)      # EUP slot, otherwise idle
    return e / s


def _vmem_limit(buffer_bytes, scratch_bytes=0):
    """Scoped-VMEM limit from the actual per-step footprint (double-buffered
    grid blocks + weights) with headroom, capped for v7x's 64 MiB VMEM."""
    need = 2 * buffer_bytes + scratch_bytes + 8 * 2**20
    return int(min(64 * 2**20, max(24 * 2**20, need)))


# ---------------------------------------------------------------------------
# Kernel 1: CrossPath (channel projections + cross attention + end proj + LN)
# ---------------------------------------------------------------------------
def _crosspath_kernel(x1_ref, x2_ref,
                      wp1y_ref, wp1u_ref, bp1y_ref, bp1u_ref,
                      wp2y_ref, wp2u_ref, bp2y_ref, bp2u_ref,
                      wk1_ref, wq1_ref, wk2_ref, wq2_ref,
                      wend1_ref, wend2_ref, bend_ref,
                      ln_g_ref, ln_b_ref, mask_ref,
                      out_ref, *, approx_recip):
    f32 = jnp.float32
    cdt = wp1y_ref.dtype                       # compute dtype (f32 or bf16)
    bt, N, C = out_ref.shape

    # Pack the whole batch tile into the matmul M dimension.
    x1 = x1_ref[...].reshape(bt * N, C).astype(cdt)
    x2 = x2_ref[...].reshape(bt * N, C).astype(cdt)

    def proj(x, w_ref, b_ref):
        return jnp.maximum(
            jnp.dot(x, w_ref[...], preferred_element_type=f32) + b_ref[...], 0.0)

    # channel_proj{1,2} with pre-split weights -> lane-aligned outputs.
    y1 = proj(x1, wp1y_ref, bp1y_ref)
    u1 = proj(x1, wp1u_ref, bp1u_ref)
    y2 = proj(x2, wp2y_ref, bp2y_ref)
    u2 = proj(x2, wp2u_ref, bp2u_ref)

    u1c = u1.astype(cdt)
    u2c = u2.astype(cdt)
    # kv projections (qkv_bias=False); the softmax scale is pre-folded into
    # the q weights in the wrapper.
    k1 = jnp.dot(u1c, wk1_ref[...], preferred_element_type=f32).astype(cdt)
    q1 = jnp.dot(u1c, wq1_ref[...], preferred_element_type=f32).astype(cdt)
    k2 = jnp.dot(u2c, wk2_ref[...], preferred_element_type=f32).astype(cdt)
    q2 = jnp.dot(u2c, wq2_ref[...], preferred_element_type=f32).astype(cdt)

    # Batched attention over the whole tile: contract tokens (axis 1), batch
    # over the bt axis.  Full-C scores with a block-diagonal additive mask
    # (0 in-head, -1e30 off-head) + one column softmax == per-head attention.
    # Mask add / max / exp all stay in f32 so masked entries exp to exactly 0.
    k1b = k1.reshape(bt, N, C)
    q1b = q1.reshape(bt, N, C)
    k2b = k2.reshape(bt, N, C)
    q2b = q2.reshape(bt, N, C)
    u1b = u1c.reshape(bt, N, C)
    u2b = u2c.reshape(bt, N, C)
    mask = mask_ref[...]                                      # (C, C) f32

    dn_kq = (((1,), (1,)), ((0,), (0,)))      # k^T q : contract tokens
    ctx1 = lax.dot_general(k1b, q1b, dn_kq, preferred_element_type=f32) + mask
    ctx2 = lax.dot_general(k2b, q2b, dn_kq, preferred_element_type=f32) + mask
    ctx1 = _softmax_over_keys(ctx1, approx_recip).astype(cdt)
    ctx2 = _softmax_over_keys(ctx2, approx_recip).astype(cdt)

    dn_uc = (((2,), (1,)), ((0,), (0,)))      # (bt,N,C) @ (bt,C,C)
    a1 = lax.dot_general(u1b, ctx2, dn_uc, preferred_element_type=f32)
    a2 = lax.dot_general(u2b, ctx1, dn_uc, preferred_element_type=f32)

    # fusion = cat(attn, raw) summed per half; end_proj2 via two matmuls with
    # the pre-split halves of the (2C, C) weight.
    f = (jnp.dot((a1.reshape(bt * N, C) + y1).astype(cdt), wend1_ref[...],
                 preferred_element_type=f32)
         + jnp.dot((a2.reshape(bt * N, C) + y2).astype(cdt), wend2_ref[...],
                   preferred_element_type=f32)
         + bend_ref[...])

    # LayerNorm over channels (biased variance, eps = 1e-5).
    mu = jnp.mean(f, axis=-1, keepdims=True)
    var = jnp.mean((f - mu) ** 2, axis=-1, keepdims=True)
    out = (f - mu) * lax.rsqrt(var + 1e-5) * ln_g_ref[...] + ln_b_ref[...]
    out_ref[...] = out.reshape(bt, N, C).astype(out_ref.dtype)


def crosspath_call(x1_tok, x2_tok, p, num_heads, compute_dtype):
    B, N, C = x1_tok.shape
    hd = C // num_heads
    scale = float(hd) ** -0.5
    cdt = compute_dtype

    # Batch-tile so every matmul sees ~256 rows when N is small, but keep the
    # grid >= 2 steps (megacore sharding + pipelining) whenever B allows it.
    if N >= 256:
        bt = 1
    else:
        bt = max(1, min(B, 256 // N))
        if B >= 2:
            bt = min(bt, max(1, B // 2))
        while B % bt:
            bt -= 1

    # Pre-split the fused weight matrices (lane-aligned matmul outputs, no
    # in-kernel lane slicing); MXU operands cast to the compute dtype, and the
    # softmax scale folded into the q-projection weights.
    wp1y, wp1u = p['wp1'][:, :C].astype(cdt), p['wp1'][:, C:].astype(cdt)
    wp2y, wp2u = p['wp2'][:, :C].astype(cdt), p['wp2'][:, C:].astype(cdt)
    bp1y, bp1u = p['bp1'][:, :C], p['bp1'][:, C:]
    bp2y, bp2u = p['bp2'][:, :C], p['bp2'][:, C:]
    wk1 = p['wkv1'][:, :C].astype(cdt)
    wq1 = (p['wkv1'][:, C:] * scale).astype(cdt)
    wk2 = p['wkv2'][:, :C].astype(cdt)
    wq2 = (p['wkv2'][:, C:] * scale).astype(cdt)
    wend1, wend2 = p['wend'][:C, :].astype(cdt), p['wend'][C:, :].astype(cdt)

    # Block-diagonal additive attention mask (0 in-head, -1e30 off-head).
    head_id = jnp.arange(C) // hd
    mask = jnp.where(head_id[:, None] == head_id[None, :], 0.0, -1e30
                     ).astype(jnp.float32)

    w_args = (wp1y, wp1u, bp1y, bp1u,
              wp2y, wp2u, bp2y, bp2u,
              wk1, wq1, wk2, wq2,
              wend1, wend2, p['bend'],
              p['ln_g'], p['ln_b'], mask)

    tok = pl.BlockSpec((bt, N, C), lambda i: (i, 0, 0))

    def const_spec(a):
        return pl.BlockSpec(a.shape, lambda i, _n=a.ndim: (0,) * _n)

    buf_bytes = (2 * bt * N * C * 4                       # x1/x2 f32 blocks
                 + bt * N * C * jnp.dtype(cdt).itemsize   # output block
                 + sum(int(a.size) * a.dtype.itemsize for a in w_args))

    kern = functools.partial(
        _crosspath_kernel,
        approx_recip=(jnp.dtype(cdt) == jnp.dtype(jnp.bfloat16)))
    return pl.pallas_call(
        kern,
        out_shape=jax.ShapeDtypeStruct((B, N, C), cdt),
        grid=(B // bt,),
        in_specs=[tok, tok] + [const_spec(a) for a in w_args],
        out_specs=tok,
        compiler_params=pltpu.CompilerParams(
            dimension_semantics=("parallel",),
            vmem_limit_bytes=_vmem_limit(buf_bytes)),
    )(x1_tok, x2_tok, *w_args)


# ---------------------------------------------------------------------------
# Kernel 2: merge-add + ChannelEmbed1 convolutions (pre-BatchNorm) + stats
# ---------------------------------------------------------------------------
def _channel_embed_stage1_kernel(xc_ref, x1_ref, x2_ref,
                                 wres_ref, w1_ref, b1_ref, wdw_ref, bdw_ref,
                                 w2_ref, b2_ref,
                                 res_ref, e3_ref, stats_ref, pad_ref):
    f32 = jnp.float32
    cdt = wres_ref.dtype
    _, H, W, C = res_ref.shape
    M = H * W

    # merge = cross_out + x1 + x2  (NHWC, per-batch block; cross_out may be
    # bf16 in the production path -- promote to f32 for the sum).
    merge = xc_ref[0].astype(f32) + x1_ref[0] + x2_ref[0]     # (H, W, C)
    m2d = merge.reshape(M, C).astype(cdt)

    # residual 1x1 conv (no bias) and first 1x1 conv of channel_embed
    res = jnp.dot(m2d, wres_ref[...], preferred_element_type=f32)
    e1 = jnp.dot(m2d, w1_ref[...], preferred_element_type=f32) + b1_ref[...]

    # 3x3 depthwise conv, padding=1, groups=C via a zero-bordered VMEM scratch
    # (only the 1-element border is zeroed; the interior is fully overwritten).
    # NOTE: for large H*W stages this block (and the full-image grid blocks)
    # should be row-tiled with a 1-row halo to stay inside v7x's 64 MiB VMEM.
    pad_ref[0:1, :, :] = jnp.zeros((1, W + 2, C), f32)
    pad_ref[H + 1:H + 2, :, :] = jnp.zeros((1, W + 2, C), f32)
    pad_ref[1:H + 1, 0:1, :] = jnp.zeros((H, 1, C), f32)
    pad_ref[1:H + 1, W + 1:W + 2, :] = jnp.zeros((H, 1, C), f32)
    pad_ref[1:H + 1, 1:W + 1, :] = e1.reshape(H, W, C)

    wdw = wdw_ref[...]                                        # (9, C) f32
    acc = jnp.zeros((H, W, C), f32)
    for dy in range(3):
        for dx in range(3):
            k = dy * 3 + dx
            wk = wdw[k:k + 1, :].reshape(1, 1, C)
            acc = acc + pad_ref[dy:dy + H, dx:dx + W, :] * wk
    acc = acc + bdw_ref[...].reshape(1, 1, C)

    # ReLU + final 1x1 conv
    e2 = jnp.maximum(acc, 0.0).reshape(M, C)
    e3 = jnp.dot(e2.astype(cdt), w2_ref[...], preferred_element_type=f32) + b2_ref[...]

    res_ref[0] = res.reshape(H, W, C).astype(res_ref.dtype)
    e3_ref[0] = e3.reshape(H, W, C).astype(e3_ref.dtype)

    # Per-block channel statistics for the two (decoupled) BatchNorms:
    # [sum res, sum res^2, sum e3, sum e3^2, sum res*e3].  Stats come from the
    # unrounded f32 values while the affine is later applied to the cdt-rounded
    # res/e3 -- the mismatch is ~bf16 eps and intentional.
    stats_ref[0] = jnp.concatenate([
        jnp.sum(res, axis=0, keepdims=True),
        jnp.sum(res * res, axis=0, keepdims=True),
        jnp.sum(e3, axis=0, keepdims=True),
        jnp.sum(e3 * e3, axis=0, keepdims=True),
        jnp.sum(res * e3, axis=0, keepdims=True)], axis=0)


def channel_embed_stage1_call(xc, x1n, x2n, p, compute_dtype):
    B, H, W, C = x1n.shape
    cdt = compute_dtype
    wres, w1, w2 = p['wres'].astype(cdt), p['w1'].astype(cdt), p['w2'].astype(cdt)

    img = pl.BlockSpec((1, H, W, C), lambda b: (b, 0, 0, 0))

    def const_spec(a):
        return pl.BlockSpec(a.shape, lambda b, _n=a.ndim: (0,) * _n)

    w_args = (wres, w1, p['b1'], p['wdw'], p['bdw'], w2, p['b2'])

    cbytes = jnp.dtype(cdt).itemsize
    buf_bytes = (H * W * C * (cbytes + 4 + 4)                 # xc + x1 + x2
                 + 2 * H * W * C * cbytes + 5 * C * 4         # res/e3/stats
                 + sum(int(a.size) * a.dtype.itemsize for a in w_args))
    scratch_bytes = (H + 2) * (W + 2) * C * 4

    return pl.pallas_call(
        _channel_embed_stage1_kernel,
        out_shape=(jax.ShapeDtypeStruct((B, H, W, C), cdt),
                   jax.ShapeDtypeStruct((B, H, W, C), cdt),
                   jax.ShapeDtypeStruct((B, 5, C), jnp.float32)),
        grid=(B,),
        in_specs=[img, img, img] + [const_spec(a) for a in w_args],
        out_specs=(img, img, pl.BlockSpec((1, 5, C), lambda b: (b, 0, 0))),
        scratch_shapes=[pltpu.VMEM((H + 2, W + 2, C), jnp.float32)],
        compiler_params=pltpu.CompilerParams(
            dimension_semantics=("parallel",),
            vmem_limit_bytes=_vmem_limit(buf_bytes, scratch_bytes)),
    )(xc, x1n, x2n, *w_args)


# ---------------------------------------------------------------------------
# Full forward (wrapper = thin layout glue + tiny BN-stat folding in XLA;
# the folded per-channel affine is left to XLA so it fuses with the final
# NHWC -> NCHW transpose instead of adding an HBM round trip).
# ---------------------------------------------------------------------------
def transformer_forward(x1_nchw, x2_nchw, params, num_heads,
                        compute_dtype=jnp.bfloat16):
    B, C, H, W = x1_nchw.shape
    N = H * W
    eps = 1e-5

    # Single NCHW -> NHWC transpose per input; token form is a free reshape.
    x1_nhwc = jnp.transpose(x1_nchw, (0, 2, 3, 1))
    x2_nhwc = jnp.transpose(x2_nchw, (0, 2, 3, 1))
    x1_tok = x1_nhwc.reshape(B, N, C)
    x2_tok = x2_nhwc.reshape(B, N, C)

    cross = crosspath_call(x1_tok, x2_tok, params, num_heads, compute_dtype)
    xc_nhwc = cross.reshape(B, H, W, C)                       # free reshape

    res, e3, stats = channel_embed_stage1_call(
        xc_nhwc, x1_nhwc, x2_nhwc, params, compute_dtype)

    # Fold the two BatchNorms (training-mode batch stats over B,H,W) into a
    # single per-channel affine:  out = s_r*res + s_e*e3 + t.
    Mtot = B * H * W
    s = jnp.sum(stats, axis=0)                                # (5, C)
    m_res, e_res2 = s[0] / Mtot, s[1] / Mtot
    m_e3, e_e32, e_cross = s[2] / Mtot, s[3] / Mtot, s[4] / Mtot
    g1, b1n = params['g1'][0], params['bt1'][0]
    g2, b2n = params['g2'][0], params['bt2'][0]

    var_e3 = e_e32 - m_e3 * m_e3
    inv1 = 1.0 / jnp.sqrt(var_e3 + eps)
    alpha = g1 * inv1                                         # bn1 scale
    cc = b1n - alpha * m_e3                                   # bn1 shift
    mu2 = m_res + alpha * m_e3 + cc
    e_pre2 = (e_res2 + alpha * alpha * e_e32 + cc * cc
              + 2.0 * alpha * e_cross + 2.0 * cc * m_res + 2.0 * alpha * cc * m_e3)
    var_pre = e_pre2 - mu2 * mu2
    inv2 = 1.0 / jnp.sqrt(var_pre + eps)
    s_r = g2 * inv2                                           # (C,)
    s_e = g2 * alpha * inv2                                   # (C,)
    t_b = g2 * (cc - mu2) * inv2 + b2n                        # (C,)

    # Per-channel affine fused by XLA with the output transpose.
    out_nhwc = (res.astype(jnp.float32) * s_r
                + e3.astype(jnp.float32) * s_e + t_b)
    return jnp.transpose(out_nhwc, (0, 3, 1, 2))              # NCHW


# ---------------------------------------------------------------------------
# Deterministic parameter init (shapes mirror the module's __init__)
# ---------------------------------------------------------------------------
def init_params(key, C):
    ks = jax.random.split(key, 9)

    def lin_w(k, fin, fout):   # trunc_normal_(std=0.02)
        return jax.random.truncated_normal(k, -2.0, 2.0, (fin, fout), jnp.float32) * 0.02

    def conv_w(k, fin, fout, fan_out):  # normal(0, sqrt(2/fan_out))
        return jax.random.normal(k, (fin, fout), jnp.float32) * (2.0 / fan_out) ** 0.5

    return {
        # CrossPath / CrossAttention (Linear weights stored as (in, out))
        'wp1': lin_w(ks[0], C, 2 * C), 'bp1': jnp.zeros((1, 2 * C), jnp.float32),
        'wp2': lin_w(ks[1], C, 2 * C), 'bp2': jnp.zeros((1, 2 * C), jnp.float32),
        'wkv1': lin_w(ks[2], C, 2 * C),
        'wkv2': lin_w(ks[3], C, 2 * C),
        'wend': lin_w(ks[4], 2 * C, C), 'bend': jnp.zeros((1, C), jnp.float32),
        'ln_g': jnp.ones((1, C), jnp.float32), 'ln_b': jnp.zeros((1, C), jnp.float32),
        # ChannelEmbed1 (1x1 convs as (Cin, Cout); depthwise 3x3 as (9, C))
        'wres': conv_w(ks[5], C, C, fan_out=C),
        'w1': conv_w(ks[6], C, C, fan_out=C), 'b1': jnp.zeros((1, C), jnp.float32),
        'wdw': jax.random.normal(ks[7], (9, C), jnp.float32) * (2.0 / 9.0) ** 0.5,
        'bdw': jnp.zeros((1, C), jnp.float32),
        'w2': conv_w(ks[8], C, C, fan_out=C), 'b2': jnp.zeros((1, C), jnp.float32),
        'g1': jnp.ones((1, C), jnp.float32), 'bt1': jnp.zeros((1, C), jnp.float32),
        'g2': jnp.ones((1, C), jnp.float32), 'bt2': jnp.zeros((1, C), jnp.float32),
    }


# ---------------------------------------------------------------------------
# Pure-JAX f32 reference (mirrors the PyTorch forward) for validation
# ---------------------------------------------------------------------------
def reference_forward(x1_nchw, x2_nchw, p, num_heads):
    B, C, H, W = x1_nchw.shape
    N = H * W
    relu = lambda v: jnp.maximum(v, 0.0)
    x1 = jnp.transpose(x1_nchw.reshape(B, C, N), (0, 2, 1))
    x2 = jnp.transpose(x2_nchw.reshape(B, C, N), (0, 2, 1))
    p1 = relu(x1 @ p['wp1'] + p['bp1']); p2 = relu(x2 @ p['wp2'] + p['bp2'])
    y1, u1 = p1[..., :C], p1[..., C:]
    y2, u2 = p2[..., :C], p2[..., C:]
    hd = C // num_heads
    scale = hd ** -0.5
    sh = lambda t: t.reshape(B, N, num_heads, hd).transpose(0, 2, 1, 3)
    v1, v2 = sh(u1), sh(u2)
    kv1 = (u1 @ p['wkv1']).reshape(B, N, 2, num_heads, hd).transpose(2, 0, 3, 1, 4)
    kv2 = (u2 @ p['wkv2']).reshape(B, N, 2, num_heads, hd).transpose(2, 0, 3, 1, 4)
    k1, q1 = kv1[0], kv1[1]
    k2, q2 = kv2[0], kv2[1]
    ctx1 = jax.nn.softmax(jnp.einsum('bhnd,bhne->bhde', k1, q1) * scale, axis=-2)
    ctx2 = jax.nn.softmax(jnp.einsum('bhnd,bhne->bhde', k2, q2) * scale, axis=-2)
    a1 = jnp.einsum('bhnd,bhde->bhne', v1, ctx2).transpose(0, 2, 1, 3).reshape(B, N, C)
    a2 = jnp.einsum('bhnd,bhde->bhne', v2, ctx1).transpose(0, 2, 1, 3).reshape(B, N, C)
    fusion = jnp.concatenate([a1, a2], -1) + jnp.concatenate([y1, y2], -1)
    f = fusion @ p['wend'] + p['bend']
    mu = f.mean(-1, keepdims=True); var = ((f - mu) ** 2).mean(-1, keepdims=True)
    x1o = (f - mu) / jnp.sqrt(var + 1e-5) * p['ln_g'] + p['ln_b']
    x1img = jnp.transpose(x1o, (0, 2, 1)).reshape(B, C, H, W)
    merge = jnp.transpose(x1img + x1_nchw + x2_nchw, (0, 2, 3, 1))   # NHWC
    res = merge @ p['wres']
    e1 = merge @ p['w1'] + p['b1']
    e1p = jnp.pad(e1, ((0, 0), (1, 1), (1, 1), (0, 0)))
    wdw = p['wdw'].reshape(3, 3, C)
    acc = jnp.zeros_like(e1)
    for dy in range(3):
        for dx in range(3):
            acc = acc + e1p[:, dy:dy + H, dx:dx + W, :] * wdw[dy, dx]
    e2 = relu(acc + p['bdw'])
    e3 = e2 @ p['w2'] + p['b2']

    def bn(t, g, b):
        mu = t.mean(axis=(0, 1, 2), keepdims=True)
        var = ((t - mu) ** 2).mean(axis=(0, 1, 2), keepdims=True)
        return (t - mu) / jnp.sqrt(var + 1e-5) * g + b

    out = bn(res + bn(e3, p['g1'], p['bt1']), p['g2'], p['bt2'])
    return jnp.transpose(out, (0, 3, 1, 2))                         # NCHW


if __name__ == "__main__":
    B, C, H, W = 2, 32, 8, 8
    num_heads = 4
    key = jax.random.PRNGKey(0)
    k1, k2, kp = jax.random.split(key, 3)
    x1 = jax.random.normal(k1, (B, C, H, W), jnp.float32)
    x2 = jax.random.normal(k2, (B, C, H, W), jnp.float32)
    params = init_params(kp, C)

    ref = reference_forward(x1, x2, params, num_heads)

    # Structural correctness: f32 MXU operands must match the reference tightly.
    out_f32 = jax.block_until_ready(
        transformer_forward(x1, x2, params, num_heads, compute_dtype=jnp.float32))
    assert out_f32.shape == (B, C, H, W)
    err32 = float(jnp.max(jnp.abs(out_f32 - ref)))
    assert err32 < 5e-3, f"f32 max abs err too large: {err32}"

    # Production configuration: bf16 MXU operands / f32 accumulation, bf16
    # inter-kernel activations, approximate EUP reciprocal in the softmax.
    out_bf16 = jax.block_until_ready(
        transformer_forward(x1, x2, params, num_heads, compute_dtype=jnp.bfloat16))
    assert out_bf16.shape == (B, C, H, W)
    err16 = float(jnp.max(jnp.abs(out_bf16 - ref)))
    assert err16 < 3e-1, f"bf16 max abs err too large: {err16}"

    print("KERNEL_OK")
</pallas_src>

<mosaic_0001>
module attributes {stable_mosaic.version = 11 : i64} {
  func.func @_crosspath_kernel(%arg0: i32, %arg1: memref<1x64x32xf32, #tpu.memory_space<vmem>>, %arg2: memref<1x64x32xf32, #tpu.memory_space<vmem>>, %arg3: memref<32x32xf32, #tpu.memory_space<vmem>>, %arg4: memref<32x32xf32, #tpu.memory_space<vmem>>, %arg5: memref<1x32xf32, #tpu.memory_space<vmem>>, %arg6: memref<1x32xf32, #tpu.memory_space<vmem>>, %arg7: memref<32x32xf32, #tpu.memory_space<vmem>>, %arg8: memref<32x32xf32, #tpu.memory_space<vmem>>, %arg9: memref<1x32xf32, #tpu.memory_space<vmem>>, %arg10: memref<1x32xf32, #tpu.memory_space<vmem>>, %arg11: memref<32x32xf32, #tpu.memory_space<vmem>>, %arg12: memref<32x32xf32, #tpu.memory_space<vmem>>, %arg13: memref<32x32xf32, #tpu.memory_space<vmem>>, %arg14: memref<32x32xf32, #tpu.memory_space<vmem>>, %arg15: memref<32x32xf32, #tpu.memory_space<vmem>>, %arg16: memref<32x32xf32, #tpu.memory_space<vmem>>, %arg17: memref<1x32xf32, #tpu.memory_space<vmem>>, %arg18: memref<1x32xf32, #tpu.memory_space<vmem>>, %arg19: memref<1x32xf32, #tpu.memory_space<vmem>>, %arg20: memref<32x32xf32, #tpu.memory_space<vmem>>, %arg21: memref<1x64x32xf32, #tpu.memory_space<vmem>>) attributes {dimension_semantics = [#tpu.dimension_semantics<parallel>], iteration_bounds = array<i64: 2>, scalar_prefetch = 0 : i64, scratch_operands = 0 : i64, tpu.core_type = #tpu.core_type<tc>, window_params = [{transform_indices = @transform_0, window_bounds = array<i64: 1, 64, 32>}, {transform_indices = @transform_1, window_bounds = array<i64: 1, 64, 32>}, {pipeline_mode = #tpu.pipeline_mode<synchronous>, transform_indices = @transform_2, window_bounds = array<i64: 32, 32>}, {pipeline_mode = #tpu.pipeline_mode<synchronous>, transform_indices = @transform_3, window_bounds = array<i64: 32, 32>}, {pipeline_mode = #tpu.pipeline_mode<synchronous>, transform_indices = @transform_4, window_bounds = array<i64: 1, 32>}, {pipeline_mode = #tpu.pipeline_mode<synchronous>, transform_indices = @transform_5, window_bounds = array<i64: 1, 32>}, {pipeline_mode = #tpu.pipeline_mode<synchronous>, transform_indices = @transform_6, window_bounds = array<i64: 32, 32>}, {pipeline_mode = #tpu.pipeline_mode<synchronous>, transform_indices = @transform_7, window_bounds = array<i64: 32, 32>}, {pipeline_mode = #tpu.pipeline_mode<synchronous>, transform_indices = @transform_8, window_bounds = array<i64: 1, 32>}, {pipeline_mode = #tpu.pipeline_mode<synchronous>, transform_indices = @transform_9, window_bounds = array<i64: 1, 32>}, {pipeline_mode = #tpu.pipeline_mode<synchronous>, transform_indices = @transform_10, window_bounds = array<i64: 32, 32>}, {pipeline_mode = #tpu.pipeline_mode<synchronous>, transform_indices = @transform_11, window_bounds = array<i64: 32, 32>}, {pipeline_mode = #tpu.pipeline_mode<synchronous>, transform_indices = @transform_12, window_bounds = array<i64: 32, 32>}, {pipeline_mode = #tpu.pipeline_mode<synchronous>, transform_indices = @transform_13, window_bounds = array<i64: 32, 32>}, {pipeline_mode = #tpu.pipeline_mode<synchronous>, transform_indices = @transform_14, window_bounds = array<i64: 32, 32>}, {pipeline_mode = #tpu.pipeline_mode<synchronous>, transform_indices = @transform_15, window_bounds = array<i64: 32, 32>}, {pipeline_mode = #tpu.pipeline_mode<synchronous>, transform_indices = @transform_16, window_bounds = array<i64: 1, 32>}, {pipeline_mode = #tpu.pipeline_mode<synchronous>, transform_indices = @transform_17, window_bounds = array<i64: 1, 32>}, {pipeline_mode = #tpu.pipeline_mode<synchronous>, transform_indices = @transform_18, window_bounds = array<i64: 1, 32>}, {pipeline_mode = #tpu.pipeline_mode<synchronous>, transform_indices = @transform_19, window_bounds = array<i64: 32, 32>}, {transform_indices = @transform_20, window_bounds = array<i64: 1, 64, 32>}]} {
    %c0 = arith.constant 0 : index
    %c0_0 = arith.constant 0 : index
    %c0_1 = arith.constant 0 : index
    %0 = vector.load %arg1[%c0, %c0_0, %c0_1] : memref<1x64x32xf32, #tpu.memory_space<vmem>>, vector<1x64x32xf32>
    %1 = vector.shape_cast %0 : vector<1x64x32xf32> to vector<64x32xf32>
    %c0_2 = arith.constant 0 : index
    %c0_3 = arith.constant 0 : index
    %c0_4 = arith.constant 0 : index
    %2 = vector.load %arg2[%c0_2, %c0_3, %c0_4] : memref<1x64x32xf32, #tpu.memory_space<vmem>>, vector<1x64x32xf32>
    %3 = vector.shape_cast %2 : vector<1x64x32xf32> to vector<64x32xf32>
    %c0_5 = arith.constant 0 : index
    %c0_6 = arith.constant 0 : index
    %4 = vector.load %arg3[%c0_5, %c0_6] : memref<32x32xf32, #tpu.memory_space<vmem>>, vector<32x32xf32>
    %cst = arith.constant dense<0.000000e+00> : vector<64x32xf32>
    %5 = tpu.matmul %1, %4, %cst {dimension_numbers = #tpu.dot_dimension_numbers<[1], [0], [0], [1], [0, 0, 1, 1], [], []>} : vector<64x32xf32>, vector<32x32xf32>, vector<64x32xf32> -> vector<64x32xf32>
    %c0_7 = arith.constant 0 : index
    %c0_8 = arith.constant 0 : index
    %6 = vector.load %arg5[%c0_7, %c0_8] : memref<1x32xf32, #tpu.memory_space<vmem>>, vector<1x32xf32>
    %7 = vector.broadcast %6 : vector<1x32xf32> to vector<64x32xf32>
    %8 = arith.addf %5, %7 : vector<64x32xf32>
    %cst_9 = arith.constant 0.000000e+00 : f32
    %9 = vector.broadcast %cst_9 : f32 to vector<64x32xf32>
    %10 = arith.maximumf %8, %9 : vector<64x32xf32>
    %c0_10 = arith.constant 0 : index
    %c0_11 = arith.constant 0 : index
    %11 = vector.load %arg4[%c0_10, %c0_11] : memref<32x32xf32, #tpu.memory_space<vmem>>, vector<32x32xf32>
    %cst_12 = arith.constant dense<0.000000e+00> : vector<64x32xf32>
    %12 = tpu.matmul %1, %11, %cst_12 {dimension_numbers = #tpu.dot_dimension_numbers<[1], [0], [0], [1], [0, 0, 1, 1], [], []>} : vector<64x32xf32>, vector<32x32xf32>, vector<64x32xf32> -> vector<64x32xf32>
    %c0_13 = arith.constant 0 : index
    %c0_14 = arith.constant 0 : index
    %13 = vector.load %arg6[%c0_13, %c0_14] : memref<1x32xf32, #tpu.memory_space<vmem>>, vector<1x32xf32>
    %14 = vector.broadcast %13 : vector<1x32xf32> to vector<64x32xf32>
    %15 = arith.addf %12, %14 : vector<64x32xf32>
    %cst_15 = arith.constant 0.000000e+00 : f32
    %16 = vector.broadcast %cst_15 : f32 to vector<64x32xf32>
    %17 = arith.maximumf %15, %16 : vector<64x32xf32>
    %c0_16 = arith.constant 0 : index
    %c0_17 = arith.constant 0 : index
    %18 = vector.load %arg7[%c0_16, %c0_17] : memref<32x32xf32, #tpu.memory_space<vmem>>, vector<32x32xf32>
    %cst_18 = arith.constant dense<0.000000e+00> : vector<64x32xf32>
    %19 = tpu.matmul %3, %18, %cst_18 {dimension_numbers = #tpu.dot_dimension_numbers<[1], [0], [0], [1], [0, 0, 1, 1], [], []>} : vector<64x32xf32>, vector<32x32xf32>, vector<64x32xf32> -> vector<64x32xf32>
    %c0_19 = arith.constant 0 : index
    %c0_20 = arith.constant 0 : index
    %20 = vector.load %arg9[%c0_19, %c0_20] : memref<1x32xf32, #tpu.memory_space<vmem>>, vector<1x32xf32>
    %21 = vector.broadcast %20 : vector<1x32xf32> to vector<64x32xf32>
    %22 = arith.addf %19, %21 : vector<64x32xf32>
    %cst_21 = arith.constant 0.000000e+00 : f32
    %23 = vector.broadcast %cst_21 : f32 to vector<64x32xf32>
    %24 = arith.maximumf %22, %23 : vector<64x32xf32>
    %c0_22 = arith.constant 0 : index
    %c0_23 = arith.constant 0 : index
    %25 = vector.load %arg8[%c0_22, %c0_23] : memref<32x32xf32, #tpu.memory_space<vmem>>, vector<32x32xf32>
    %cst_24 = arith.constant dense<0.000000e+00> : vector<64x32xf32>
    %26 = tpu.matmul %3, %25, %cst_24 {dimension_numbers = #tpu.dot_dimension_numbers<[1], [0], [0], [1], [0, 0, 1, 1], [], []>} : vector<64x32xf32>, vector<32x32xf32>, vector<64x32xf32> -> vector<64x32xf32>
    %c0_25 = arith.constant 0 : index
    %c0_26 = arith.constant 0 : index
    %27 = vector.load %arg10[%c0_25, %c0_26] : memref<1x32xf32, #tpu.memory_space<vmem>>, vector<1x32xf32>
    %28 = vector.broadcast %27 : vector<1x32xf32> to vector<64x32xf32>
    %29 = arith.addf %26, %28 : vector<64x32xf32>
    %cst_27 = arith.constant 0.000000e+00 : f32
    %30 = vector.broadcast %cst_27 : f32 to vector<64x32xf32>
    %31 = arith.maximumf %29, %30 : vector<64x32xf32>
    %c0_28 = arith.constant 0 : index
    %c0_29 = arith.constant 0 : index
    %32 = vector.load %arg11[%c0_28, %c0_29] : memref<32x32xf32, #tpu.memory_space<vmem>>, vector<32x32xf32>
    %cst_30 = arith.constant dense<0.000000e+00> : vector<64x32xf32>
    %33 = tpu.matmul %17, %32, %cst_30 {dimension_numbers = #tpu.dot_dimension_numbers<[1], [0], [0], [1], [0, 0, 1, 1], [], []>} : vector<64x32xf32>, vector<32x32xf32>, vector<64x32xf32> -> vector<64x32xf32>
    %c0_31 = arith.constant 0 : index
    %c0_32 = arith.constant 0 : index
    %34 = vector.load %arg12[%c0_31, %c0_32] : memref<32x32xf32, #tpu.memory_space<vmem>>, vector<32x32xf32>
    %cst_33 = arith.constant dense<0.000000e+00> : vector<64x32xf32>
    %35 = tpu.matmul %17, %34, %cst_33 {dimension_numbers = #tpu.dot_dimension_numbers<[1], [0], [0], [1], [0, 0, 1, 1], [], []>} : vector<64x32xf32>, vector<32x32xf32>, vector<64x32xf32> -> vector<64x32xf32>
    %c0_34 = arith.constant 0 : index
    %c0_35 = arith.constant 0 : index
    %36 = vector.load %arg13[%c0_34, %c0_35] : memref<32x32xf32, #tpu.memory_space<vmem>>, vector<32x32xf32>
    %cst_36 = arith.constant dense<0.000000e+00> : vector<64x32xf32>
    %37 = tpu.matmul %31, %36, %cst_36 {dimension_numbers = #tpu.dot_dimension_numbers<[1], [0], [0], [1], [0, 0, 1, 1], [], []>} : vector<64x32xf32>, vector<32x32xf32>, vector<64x32xf32> -> vector<64x32xf32>
    %c0_37 = arith.constant 0 : index
    %c0_38 = arith.constant 0 : index
    %38 = vector.load %arg14[%c0_37, %c0_38] : memref<32x32xf32, #tpu.memory_space<vmem>>, vector<32x32xf32>
    %cst_39 = arith.constant dense<0.000000e+00> : vector<64x32xf32>
    %39 = tpu.matmul %31, %38, %cst_39 {dimension_numbers = #tpu.dot_dimension_numbers<[1], [0], [0], [1], [0, 0, 1, 1], [], []>} : vector<64x32xf32>, vector<32x32xf32>, vector<64x32xf32> -> vector<64x32xf32>
    %40 = vector.shape_cast %33 : vector<64x32xf32> to vector<1x64x32xf32>
    %41 = vector.shape_cast %35 : vector<64x32xf32> to vector<1x64x32xf32>
    %42 = vector.shape_cast %37 : vector<64x32xf32> to vector<1x64x32xf32>
    %43 = vector.shape_cast %39 : vector<64x32xf32> to vector<1x64x32xf32>
    %44 = vector.shape_cast %17 : vector<64x32xf32> to vector<1x64x32xf32>
    %45 = vector.shape_cast %31 : vector<64x32xf32> to vector<1x64x32xf32>
    %c0_40 = arith.constant 0 : index
    %c0_41 = arith.constant 0 : index
    %46 = vector.load %arg20[%c0_40, %c0_41] : memref<32x32xf32, #tpu.memory_space<vmem>>, vector<32x32xf32>
    %cst_42 = arith.constant dense<0.000000e+00> : vector<1x32x32xf32>
    %47 = tpu.matmul %40, %41, %cst_42 {dimension_numbers = #tpu.dot_dimension_numbers<[1], [1], [2], [2], [0, 0, 0, 2, 1, 2], [0], [0]>} : vector<1x64x32xf32>, vector<1x64x32xf32>, vector<1x32x32xf32> -> vector<1x32x32xf32>
    %48 = vector.shape_cast %46 : vector<32x32xf32> to vector<1x32x32xf32>
    %49 = arith.addf %47, %48 : vector<1x32x32xf32>
    %cst_43 = arith.constant dense<0.000000e+00> : vector<1x32x32xf32>
    %50 = tpu.matmul %42, %43, %cst_43 {dimension_numbers = #tpu.dot_dimension_numbers<[1], [1], [2], [2], [0, 0, 0, 2, 1, 2], [0], [0]>} : vector<1x64x32xf32>, vector<1x64x32xf32>, vector<1x32x32xf32> -> vector<1x32x32xf32>
    %51 = vector.shape_cast %46 : vector<32x32xf32> to vector<1x32x32xf32>
    %52 = arith.addf %50, %51 : vector<1x32x32xf32>
    %cst_44 = arith.constant dense<0xFF800000> : vector<1x32xf32>
    %53 = vector.multi_reduction <maximumf>, %49, %cst_44 [1] : vector<1x32x32xf32> to vector<1x32xf32>
    %54 = vector.shape_cast %53 : vector<1x32xf32> to vector<1x1x32xf32>
    %55 = vector.broadcast %54 : vector<1x1x32xf32> to vector<1x32x32xf32>
    %56 = arith.subf %49, %55 : vector<1x32x32xf32>
    %57 = math.exp %56 : vector<1x32x32xf32>
    %cst_45 = arith.constant dense<0.000000e+00> : vector<1x32xf32>
    %58 = vector.multi_reduction <add>, %57, %cst_45 [1] : vector<1x32x32xf32> to vector<1x32xf32>
    %59 = vector.shape_cast %58 : vector<1x32xf32> to vector<1x1x32xf32>
    %60 = vector.broadcast %59 : vector<1x1x32xf32> to vector<1x32x32xf32>
    %61 = arith.divf %57, %60 : vector<1x32x32xf32>
    %cst_46 = arith.constant dense<0xFF800000> : vector<1x32xf32>
    %62 = vector.multi_reduction <maximumf>, %52, %cst_46 [1] : vector<1x32x32xf32> to vector<1x32xf32>
    %63 = vector.shape_cast %62 : vector<1x32xf32> to vector<1x1x32xf32>
    %64 = vector.broadcast %63 : vector<1x1x32xf32> to vector<1x32x32xf32>
    %65 = arith.subf %52, %64 : vector<1x32x32xf32>
    %66 = math.exp %65 : vector<1x32x32xf32>
    %cst_47 = arith.constant dense<0.000000e+00> : vector<1x32xf32>
    %67 = vector.multi_reduction <add>, %66, %cst_47 [1] : vector<1x32x32xf32> to vector<1x32xf32>
    %68 = vector.shape_cast %67 : vector<1x32xf32> to vector<1x1x32xf32>
    %69 = vector.broadcast %68 : vector<1x1x32xf32> to vector<1x32x32xf32>
    %70 = arith.divf %66, %69 : vector<1x32x32xf32>
    %cst_48 = arith.constant dense<0.000000e+00> : vector<1x64x32xf32>
    %71 = tpu.matmul %44, %70, %cst_48 {dimension_numbers = #tpu.dot_dimension_numbers<[2], [1], [1], [2], [0, 0, 0, 1, 1, 2], [0], [0]>} : vector<1x64x32xf32>, vector<1x32x32xf32>, vector<1x64x32xf32> -> vector<1x64x32xf32>
    %cst_49 = arith.constant dense<0.000000e+00> : vector<1x64x32xf32>
    %72 = tpu.matmul %45, %61, %cst_49 {dimension_numbers = #tpu.dot_dimension_numbers<[2], [1], [1], [2], [0, 0, 0, 1, 1, 2], [0], [0]>} : vector<1x64x32xf32>, vector<1x32x32xf32>, vector<1x64x32xf32> -> vector<1x64x32xf32>
    %73 = vector.shape_cast %71 : vector<1x64x32xf32> to vector<64x32xf32>
    %74 = arith.addf %73, %10 : vector<64x32xf32>
    %c0_50 = arith.constant 0 : index
    %c0_51 = arith.constant 0 : index
    %75 = vector.load %arg15[%c0_50, %c0_51] : memref<32x32xf32, #tpu.memory_space<vmem>>, vector<32x32xf32>
    %cst_52 = arith.constant dense<0.000000e+00> : vector<64x32xf32>
    %76 = tpu.matmul %74, %75, %cst_52 {dimension_numbers = #tpu.dot_dimension_numbers<[1], [0], [0], [1], [0, 0, 1, 1], [], []>} : vector<64x32xf32>, vector<32x32xf32>, vector<64x32xf32> -> vector<64x32xf32>
    %77 = vector.shape_cast %72 : vector<1x64x32xf32> to vector<64x32xf32>
    %78 = arith.addf %77, %24 : vector<64x32xf32>
    %c0_53 = arith.constant 0 : index
    %c0_54 = arith.constant 0 : index
    %79 = vector.load %arg16[%c0_53, %c0_54] : memref<32x32xf32, #tpu.memory_space<vmem>>, vector<32x32xf32>
    %cst_55 = arith.constant dense<0.000000e+00> : vector<64x32xf32>
    %80 = tpu.matmul %78, %79, %cst_55 {dimension_numbers = #tpu.dot_dimension_numbers<[1], [0], [0], [1], [0, 0, 1, 1], [], []>} : vector<64x32xf32>, vector<32x32xf32>, vector<64x32xf32> -> vector<64x32xf32>
    %81 = arith.addf %76, %80 : vector<64x32xf32>
    %c0_56 = arith.constant 0 : index
    %c0_57 = arith.constant 0 : index
    %82 = vector.load %arg17[%c0_56, %c0_57] : memref<1x32xf32, #tpu.memory_space<vmem>>, vector<1x32xf32>
    %83 = vector.broadcast %82 : vector<1x32xf32> to vector<64x32xf32>
    %84 = arith.addf %81, %83 : vector<64x32xf32>
    %cst_58 = arith.constant dense<0.000000e+00> : vector<64xf32>
    %85 = vector.multi_reduction <add>, %84, %cst_58 [1] : vector<64x32xf32> to vector<64xf32>
    %86 = vector.shape_cast %85 : vector<64xf32> to vector<64x1xf32>
    %cst_59 = arith.constant 3.200000e+01 : f32
    %87 = vector.broadcast %cst_59 : f32 to vector<64x1xf32>
    %88 = arith.divf %86, %87 : vector<64x1xf32>
    %89 = vector.broadcast %88 : vector<64x1xf32> to vector<64x32xf32>
    %90 = arith.subf %84, %89 : vector<64x32xf32>
    %91 = arith.mulf %90, %90 : vector<64x32xf32>
    %cst_60 = arith.constant dense<0.000000e+00> : vector<64xf32>
    %92 = vector.multi_reduction <add>, %91, %cst_60 [1] : vector<64x32xf32> to vector<64xf32>
    %93 = vector.shape_cast %92 : vector<64xf32> to vector<64x1xf32>
    %cst_61 = arith.constant 3.200000e+01 : f32
    %94 = vector.broadcast %cst_61 : f32 to vector<64x1xf32>
    %95 = arith.divf %93, %94 : vector<64x1xf32>
    %96 = vector.broadcast %88 : vector<64x1xf32> to vector<64x32xf32>
    %97 = arith.subf %84, %96 : vector<64x32xf32>
    %cst_62 = arith.constant 9.99999974E-6 : f32
    %98 = vector.broadcast %cst_62 : f32 to vector<64x1xf32>
    %99 = arith.addf %95, %98 : vector<64x1xf32>
    %100 = math.rsqrt %99 : vector<64x1xf32>
    %101 = vector.broadcast %100 : vector<64x1xf32> to vector<64x32xf32>
    %102 = arith.mulf %97, %101 : vector<64x32xf32>
    %c0_63 = arith.constant 0 : index
    %c0_64 = arith.constant 0 : index
    %103 = vector.load %arg18[%c0_63, %c0_64] : memref<1x32xf32, #tpu.memory_space<vmem>>, vector<1x32xf32>
    %104 = vector.broadcast %103 : vector<1x32xf32> to vector<64x32xf32>
    %105 = arith.mulf %102, %104 : vector<64x32xf32>
    %c0_65 = arith.constant 0 : index
    %c0_66 = arith.constant 0 : index
    %106 = vector.load %arg19[%c0_65, %c0_66] : memref<1x32xf32, #tpu.memory_space<vmem>>, vector<1x32xf32>
    %107 = vector.broadcast %106 : vector<1x32xf32> to vector<64x32xf32>
    %108 = arith.addf %105, %107 : vector<64x32xf32>
    %109 = vector.shape_cast %108 : vector<64x32xf32> to vector<1x64x32xf32>
    %c0_67 = arith.constant 0 : index
    %c0_68 = arith.constant 0 : index
    %c0_69 = arith.constant 0 : index
    %110 = vector.load %arg21[%c0_67, %c0_68, %c0_69] : memref<1x64x32xf32, #tpu.memory_space<vmem>>, vector<1x64x32xf32>
    tpu.vector_store %arg21[%c0_67, %c0_68, %c0_69], %109 {strides = array<i32>} : memref<1x64x32xf32, #tpu.memory_space<vmem>>, vector<1x64x32xf32>,
    return
  }
  func.func @transform_0(%arg0: i32) -> (i32, i32, i32) {
    %c0_i32 = arith.constant 0 : i32
    %c0_i32_0 = arith.constant 0 : i32
    %c0_i32_1 = arith.constant 0 : i32
    return %arg0, %c0_i32, %c0_i32_0 : i32, i32, i32
  }
  func.func @transform_1(%arg0: i32) -> (i32, i32, i32) {
    %c0_i32 = arith.constant 0 : i32
    %c0_i32_0 = arith.constant 0 : i32
    %c0_i32_1 = arith.constant 0 : i32
    return %arg0, %c0_i32, %c0_i32_0 : i32, i32, i32
  }
  func.func @transform_2(%arg0: i32) -> (i32, i32) {
    %c0_i32 = arith.constant 0 : i32
    %c0_i32_0 = arith.constant 0 : i32
    %c0_i32_1 = arith.constant 0 : i32
    return %c0_i32, %c0_i32_0 : i32, i32
  }
  func.func @transform_3(%arg0: i32) -> (i32, i32) {
    %c0_i32 = arith.constant 0 : i32
    %c0_i32_0 = arith.constant 0 : i32
    %c0_i32_1 = arith.constant 0 : i32
    return %c0_i32, %c0_i32_0 : i32, i32
  }
  func.func @transform_4(%arg0: i32) -> (i32, i32) {
    %c0_i32 = arith.constant 0 : i32
    %c0_i32_0 = arith.constant 0 : i32
    %c0_i32_1 = arith.constant 0 : i32
    return %c0_i32, %c0_i32_0 : i32, i32
  }
  func.func @transform_5(%arg0: i32) -> (i32, i32) {
    %c0_i32 = arith.constant 0 : i32
    %c0_i32_0 = arith.constant 0 : i32
    %c0_i32_1 = arith.constant 0 : i32
    return %c0_i32, %c0_i32_0 : i32, i32
  }
  func.func @transform_6(%arg0: i32) -> (i32, i32) {
    %c0_i32 = arith.constant 0 : i32
    %c0_i32_0 = arith.constant 0 : i32
    %c0_i32_1 = arith.constant 0 : i32
    return %c0_i32, %c0_i32_0 : i32, i32
  }
  func.func @transform_7(%arg0: i32) -> (i32, i32) {
    %c0_i32 = arith.constant 0 : i32
    %c0_i32_0 = arith.constant 0 : i32
    %c0_i32_1 = arith.constant 0 : i32
    return %c0_i32, %c0_i32_0 : i32, i32
  }
  func.func @transform_8(%arg0: i32) -> (i32, i32) {
    %c0_i32 = arith.constant 0 : i32
    %c0_i32_0 = arith.constant 0 : i32
    %c0_i32_1 = arith.constant 0 : i32
    return %c0_i32, %c0_i32_0 : i32, i32
  }
  func.func @transform_9(%arg0: i32) -> (i32, i32) {
    %c0_i32 = arith.constant 0 : i32
    %c0_i32_0 = arith.constant 0 : i32
    %c0_i32_1 = arith.constant 0 : i32
    return %c0_i32, %c0_i32_0 : i32, i32
  }
  func.func @transform_10(%arg0: i32) -> (i32, i32) {
    %c0_i32 = arith.constant 0 : i32
    %c0_i32_0 = arith.constant 0 : i32
    %c0_i32_1 = arith.constant 0 : i32
    return %c0_i32, %c0_i32_0 : i32, i32
  }
  func.func @transform_11(%arg0: i32) -> (i32, i32) {
    %c0_i32 = arith.constant 0 : i32
    %c0_i32_0 = arith.constant 0 : i32
    %c0_i32_1 = arith.constant 0 : i32
    return %c0_i32, %c0_i32_0 : i32, i32
  }
  func.func @transform_12(%arg0: i32) -> (i32, i32) {
    %c0_i32 = arith.constant 0 : i32
    %c0_i32_0 = arith.constant 0 : i32
    %c0_i32_1 = arith.constant 0 : i32
    return %c0_i32, %c0_i32_0 : i32, i32
  }
  func.func @transform_13(%arg0: i32) -> (i32, i32) {
    %c0_i32 = arith.constant 0 : i32
    %c0_i32_0 = arith.constant 0 : i32
    %c0_i32_1 = arith.constant 0 : i32
    return %c0_i32, %c0_i32_0 : i32, i32
  }
  func.func @transform_14(%arg0: i32) -> (i32, i32) {
    %c0_i32 = arith.constant 0 : i32
    %c0_i32_0 = arith.constant 0 : i32
    %c0_i32_1 = arith.constant 0 : i32
    return %c0_i32, %c0_i32_0 : i32, i32
  }
  func.func @transform_15(%arg0: i32) -> (i32, i32) {
    %c0_i32 = arith.constant 0 : i32
    %c0_i32_0 = arith.constant 0 : i32
    %c0_i32_1 = arith.constant 0 : i32
    return %c0_i32, %c0_i32_0 : i32, i32
  }
  func.func @transform_16(%arg0: i32) -> (i32, i32) {
    %c0_i32 = arith.constant 0 : i32
    %c0_i32_0 = arith.constant 0 : i32
    %c0_i32_1 = arith.constant 0 : i32
    return %c0_i32, %c0_i32_0 : i32, i32
  }
  func.func @transform_17(%arg0: i32) -> (i32, i32) {
    %c0_i32 = arith.constant 0 : i32
    %c0_i32_0 = arith.constant 0 : i32
    %c0_i32_1 = arith.constant 0 : i32
    return %c0_i32, %c0_i32_0 : i32, i32
  }
  func.func @transform_18(%arg0: i32) -> (i32, i32) {
    %c0_i32 = arith.constant 0 : i32
    %c0_i32_0 = arith.constant 0 : i32
    %c0_i32_1 = arith.constant 0 : i32
    return %c0_i32, %c0_i32_0 : i32, i32
  }
  func.func @transform_19(%arg0: i32) -> (i32, i32) {
    %c0_i32 = arith.constant 0 : i32
    %c0_i32_0 = arith.constant 0 : i32
    %c0_i32_1 = arith.constant 0 : i32
    return %c0_i32, %c0_i32_0 : i32, i32
  }
  func.func @transform_20(%arg0: i32) -> (i32, i32, i32) {
    %c0_i32 = arith.constant 0 : i32
    %c0_i32_0 = arith.constant 0 : i32
    %c0_i32_1 = arith.constant 0 : i32
    return %arg0, %c0_i32, %c0_i32_0 : i32, i32, i32
  }
}

</mosaic_0001>

<bundles_post_ra>
// kernel: tpu_custom_call.1
= control target key start
LH: loop header
LB: loop body
LE: loop exit
PB: predicated region body
PF: predicated region fallthrough
CT: control target
= control target key end

     0   :  { %s4138_s0 = inlined_call_operand.vmem [shape: f32[2,64,32], index: 0, kind: input, shape index: {}]   ;;  %s4139_s1 = inlined_call_operand.vmem [shape: f32[2,64,32], index: 1, kind: input, shape index: {}]   ;;  %s4140_s2 = inlined_call_operand.vmem [shape: f32[32,32], index: 2, kind: input, shape index: {}]   ;;  %s4141_s3 = inlined_call_operand.vmem [shape: f32[32,32], index: 3, kind: input, shape index: {}]   ;;  %s4142_s4 = inlined_call_operand.vmem [shape: f32[1,32], index: 4, kind: input, shape index: {}]   ;;  %s4143_s5 = inlined_call_operand.vmem [shape: f32[1,32], index: 5, kind: input, shape index: {}]   ;;  %s4144_s6 = inlined_call_operand.vmem [shape: f32[32,32], index: 6, kind: input, shape index: {}]   ;;  %s4145_s7 = inlined_call_operand.vmem [shape: f32[32,32], index: 7, kind: input, shape index: {}]   ;;  %s4146_s8 = inlined_call_operand.vmem [shape: f32[1,32], index: 8, kind: input, shape index: {}]   ;;  %s4147_s9 = inlined_call_operand.vmem [shape: f32[1,32], index: 9, kind: input, shape index: {}]   ;;  %s4148_s10 = inlined_call_operand.vmem [shape: f32[32,32], index: 10, kind: input, shape index: {}]   ;;  %s4149_s11 = inlined_call_operand.vmem [shape: f32[32,32], index: 11, kind: input, shape index: {}]   ;;  %s4150_s12 = inlined_call_operand.vmem [shape: f32[32,32], index: 12, kind: input, shape index: {}]   ;;  %s4151_s13 = inlined_call_operand.vmem [shape: f32[32,32], index: 13, kind: input, shape index: {}]   ;;  %s4152_s14 = inlined_call_operand.vmem [shape: f32[32,32], index: 14, kind: input, shape index: {}]   ;;  %s4153_s15 = inlined_call_operand.vmem [shape: f32[32,32], index: 15, kind: input, shape index: {}]   ;;  %s4154_s16 = inlined_call_operand.vmem [shape: f32[1,32], index: 16, kind: input, shape index: {}]   ;;  %s4155_s17 = inlined_call_operand.vmem [shape: f32[1,32], index: 17, kind: input, shape index: {}]   ;;  %s4156_s18 = inlined_call_operand.vmem [shape: f32[1,32], index: 18, kind: input, shape index: {}]   ;;  %s4157_s19 = inlined_call_operand.vmem [shape: f32[32,32], index: 19, kind: input, shape index: {}]   ;;  %s4158_s20 = inlined_call_operand.vmem [shape: f32[2,64,32], index: 20, kind: output, shape index: {}]  }
   0x1   :  { %4161 = sst [smem:[#allocation2_spill]] %s4138_s0 }
   0x2   :  { %4162 = sst [smem:[#allocation3_spill]] %s4139_s1  ;;  %s3618_s1 = smov 0  }
   0x3   :  { %4163 = sst [smem:[#allocation4_spill]] %s4140_s2 }
   0x4   :  { %4164 = sst [smem:[#allocation5_spill]] %s4141_s3 }
   0x5   :  { %4165 = sst [smem:[#allocation6_spill]] %s4142_s4 }
   0x6 LB: > { %s2745_s22 = sadd.s32 4294967295, %s3511_s1   ;;  %p2749_p0 = scmp.ge.s32.totalorder %s3511_s1, 1  ;;  %s3511_s1 = sphi %s3618_s1, %s30_s1  }
   0x7   : > { %p572_p1 = scmp.lt.s32.totalorder %s3511_s1, 3 }
   0x9   : > { %p573_p2 = pnand %p2749_p0, %p572_p1 }
   0xa   : > { %s4166_s2 = sld [smem:[#allocation4_spill]] (!%p573_p2)  ;;  %p635_p3 = scmp.lt.s32.totalorder (!%p573_p2), %s2745_s22, 1  ;;  %vm677_vm0 = vcmask (!%p573_p2), 261120   ;;  %v939_v8 = vld [vmem:[%s4144_s6] sm:$0xff] (!%p573_p2)  ;;  %v940_v9 = vld [vmem:[%s4144_s6 + $0x8] sm:$0xff] (!%p573_p2)  ;;  %v1089_v27 = vld [vmem:[%s4145_s7 + $0x10] sm:$0xff] (!%p573_p2) }
   0xb   : > { %576 = sbr.rel (%p573_p2) target bundleno = 1683 (0x693), region = 100  ;;  %s4167_s0 = sld [smem:[#allocation5_spill]] (!%p573_p2)  ;;  %v3340_v11 = vpack.c.bf16 (!%p573_p2), %v940_v9, %v939_v8  ;;  %v1087_v19 = vld [vmem:[%s4145_s7] sm:$0xff] (!%p573_p2)  ;;  %v1088_v20 = vld [vmem:[%s4145_s7 + $0x8] sm:$0xff] (!%p573_p2)  ;;  %v1090_v28 = vld [vmem:[%s4145_s7 + $0x18] sm:$0xff] (!%p573_p2)  ;;  %vm1731_vm1 = vcmask (!%p573_p2), 523264  }
   0xc   : > { %s4168_s29 = sld [smem:[#allocation2_spill]] (!%p573_p2)  ;;  %s4169_s27 = sld [smem:[#allocation3_spill]] (!%p573_p2)  ;;  %v3348_v23 = vpack.c.bf16 (!%p573_p2), %v1088_v20, %v1087_v19  ;;  %v3352_v29 = vpack.c.bf16 (!%p573_p2), %v1090_v28, %v1089_v27  ;;  %v941_v37 = vld [vmem:[%s4144_s6 + $0x10] sm:$0xff] (!%p573_p2)  ;;  %v942_v38 = vld [vmem:[%s4144_s6 + $0x18] sm:$0xff] (!%p573_p2)  ;;  %v1211_v40 = vld [vmem:[%s4148_s10] sm:$0xff] (!%p573_p2) }
   0xd   : > { %3341 = vmatprep.subr.bf16.mxu0 (!%p573_p2), %v3340_v11  ;;  %v3344_v39 = vpack.c.bf16 (!%p573_p2), %v942_v38, %v941_v37  ;;  %v1212_v41 = vld [vmem:[%s4148_s10 + $0x8] sm:$0xff] (!%p573_p2)  ;;  %v1344_v43 = vld [vmem:[%s4149_s11] sm:$0xff] (!%p573_p2)  ;;  %v1213_v46 = vld [vmem:[%s4148_s10 + $0x10] sm:$0xff] (!%p573_p2)  ;;  %s4170_s4 = sld [smem:[#allocation6_spill]] (!%p573_p2) }
   0xe   : > { %3343 = vmatpush3.bf16.msra.mxu0 (!%p573_p2), %v3340_v11  ;;  %v3356_v42 = vpack.c.bf16 (!%p573_p2), %v1212_v41, %v1211_v40  ;;  %v1345_v44 = vld [vmem:[%s4149_s11 + $0x8] sm:$0xff] (!%p573_p2)  ;;  %v1214_v47 = vld [vmem:[%s4148_s10 + $0x18] sm:$0xff] (!%p573_p2)  ;;  %v1346_v49 = vld [vmem:[%s4149_s11 + $0x10] sm:$0xff] (!%p573_p2) }
   0xf   : > { %3345 = vmatprep.subr.bf16.mxu0 (!%p573_p2), %v3344_v39  ;;  %v3364_v45 = vpack.c.bf16 (!%p573_p2), %v1345_v44, %v1344_v43  ;;  %v3360_v48 = vpack.c.bf16 (!%p573_p2), %v1214_v47, %v1213_v46  ;;  %v1347_v50 = vld [vmem:[%s4149_s11 + $0x18] sm:$0xff] (!%p573_p2)  ;;  %v1453_v52 = vld [vmem:[%s4150_s12] sm:$0xff] (!%p573_p2)  ;;  %v1454_v53 = vld [vmem:[%s4150_s12 + $0x8] sm:$0xff] (!%p573_p2) }
  0x10   : > { %v666_v0 = vld [vmem:[%s4166_s2] sm:$0xff] (!%p573_p2)  ;;  %v667_v1 = vld [vmem:[%s4166_s2 + $0x8] sm:$0xff] (!%p573_p2)  ;;  %v668_v2 = vld [vmem:[%s4166_s2 + $0x10] sm:$0xff] (!%p573_p2)  ;;  %v3368_v51 = vpack.c.bf16 (!%p573_p2), %v1347_v50, %v1346_v49  ;;  %v3372_v54 = vpack.c.bf16 (!%p573_p2), %v1454_v53, %v1453_v52 }
  0x11   : > { %v3324_v3 = vpack.c.bf16 (!%p573_p2), %v667_v1, %v666_v0  ;;  %v669_v4 = vld [vmem:[%s4166_s2 + $0x18] sm:$0xff] (!%p573_p2)  ;;  %v815_v6 = vld [vmem:[%s4167_s0] sm:$0xff] (!%p573_p2)  ;;  %v816_v7 = vld [vmem:[%s4167_s0 + $0x8] sm:$0xff] (!%p573_p2) }
  0x12   : > { %v3328_v5 = vpack.c.bf16 %v669_v4, %v668_v2  ;;  %s4172_s22 = smov (!%p635_p3, %s2745_s22), 1  ;;  %v3332_v10 = vpack.c.bf16 %v816_v7, %v815_v6  ;;  %v817_v13 = vld [vmem:[%s4167_s0 + $0x10] sm:$0xff]  ;;  %v818_v14 = vld [vmem:[%s4167_s0 + $0x18] sm:$0xff]  ;;  %3347 = vmatpush3.bf16.msra.mxu0 %v3344_v39  ;;  %v1586_v55 = vld [vmem:[%s4151_s13] sm:$0xff] }
  0x13   : > { %3325 = vmatprep.subr.bf16.mxu1 %v3324_v3  ;;  %s3644_s24 = sshll.u32 %s4172_s22, 6  ;;  %v3336_v18 = vpack.c.bf16 %v818_v14, %v817_v13  ;;  %3357 = vmatprep.subr.bf16.mxu0 %v3356_v42  ;;  %v1587_v56 = vld [vmem:[%s4151_s13 + $0x8] sm:$0xff]  ;;  %v2765_v2 = vld [vmem:[%s4143_s5] ss:$0 sm:$0xff]  ;;  %v1455_v6 = vld [vmem:[%s4150_s12 + $0x10] sm:$0xff] }
  0x14   : > { %3327 = vmatpush3.bf16.msra.mxu1 %v3324_v3  ;;  %s3656_s30 = scalar_lea.vmem %s4168_s29, %s3644_s24  ;;  %s3669_s28 = scalar_lea.vmem %s4169_s27, %s3644_s24  ;;  %v3380_v57 = vpack.c.bf16 %v1587_v56, %v1586_v55  ;;  %v1456_v8 = vld [vmem:[%s4150_s12 + $0x18] sm:$0xff]  ;;  %v1588_v9 = vld [vmem:[%s4151_s13 + $0x10] sm:$0xff] }
  0x15   : > { %3329 = vmatprep.subr.bf16.mxu1 %v3328_v5  ;;  %v650_v12 = vld [vmem:[%s3656_s30] sm:$0xff]  ;;  %v651_v15 = vld [vmem:[%s3656_s30 + $0x8] sm:$0xff]  ;;  %v652_v17 = vld [vmem:[%s3656_s30 + $0x10] sm:$0xff] }
  0x16   : > { %3048 = vmatprep.mubr.msk.f32.mxu1 %vm677_vm0, %v650_v12  ;;  %v658_v16 = vld [vmem:[%s3669_s28] sm:$0xff]  ;;  %v653_v21 = vld [vmem:[%s3656_s30 + $0x18] sm:$0xff]  ;;  %v655_v24 = vld [vmem:[%s3656_s30 + $0x28] sm:$0xff] }
  0x17   : > { %3088 = vmatprep.mubr.msk.f32.mxu0 %vm677_vm0, %v658_v16  ;;  %v654_v22 = vld [vmem:[%s3656_s30 + $0x20] sm:$0xff]  ;;  %v656_v25 = vld [vmem:[%s3656_s30 + $0x30] sm:$0xff]  ;;  %v657_v26 = vld [vmem:[%s3656_s30 + $0x38] sm:$0xff]  ;;  %s4111_s30 = scalar_lea.vmem %s4158_s20, %s3644_s24 }
  0x18   : > { %3331 = vmatpush3.bf16.msra.mxu1 %v3328_v5  ;;  %v659_v30 = vld [vmem:[%s3669_s28 + $0x8] sm:$0xff]  ;;  %v660_v31 = vld [vmem:[%s3669_s28 + $0x10] sm:$0xff]  ;;  %v661_v32 = vld [vmem:[%s3669_s28 + $0x18] sm:$0xff] }
  0x19   : > { %3333 = vmatprep.subr.bf16.mxu1 %v3332_v10  ;;  %v662_v33 = vld [vmem:[%s3669_s28 + $0x20] sm:$0xff]  ;;  %v663_v34 = vld [vmem:[%s3669_s28 + $0x28] sm:$0xff]  ;;  %v664_v35 = vld [vmem:[%s3669_s28 + $0x30] sm:$0xff]  ;;  %3089 = vmatmul.mubr.msk.f32.vlgmr.msra.gmra.mrb[0].mxu0 %vm677_vm0, %v659_v30 }
  0x1a   : > { %v665_v36 = vld [vmem:[%s3669_s28 + $0x38] sm:$0xff]  ;;  %3091 = vmatprep.mubr.msk.f32.mxu0 %vm677_vm0, %v660_v31  ;;  %3359 = vmatpush3.bf16.msra.mxu0 %v3356_v42 }
  0x1b   : > { %3049 = vmatmul.mubr.msk.f32.vlgmr.msra.gmra.mrb[0].mxu1 %vm677_vm0, %v651_v15  ;;  %3361 = vmatprep.subr.bf16.mxu0 %v3360_v48 }
  0x1c   : > { %3335 = vmatpush3.bf16.msra.mxu1 %v3332_v10  ;;  %3051 = vmatprep.mubr.msk.f32.mxu1 %vm677_vm0, %v652_v17  ;;  %v1589_v10 = vld [vmem:[%s4151_s13 + $0x18] sm:$0xff] }
  0x1d   : > { %3337 = vmatprep.subr.bf16.mxu1 %v3336_v18  ;;  %3092 = vmatmul.mubr.msk.f32.gmra.mrb[2].mxu0 %vm677_vm0, %v661_v32 }
  0x1e   : > { %3094 = vmatprep.mubr.msk.f32.mxu0 %vm677_vm0, %v662_v33  ;;  %3363 = vmatpush3.bf16.msra.mxu0 %v3360_v48 }
  0x1f   : > { %3052 = vmatmul.mubr.msk.f32.gmra.mrb[2].mxu1 %vm677_vm0, %v653_v21  ;;  %3373 = vmatprep.subr.bf16.mxu0 %v3372_v54 }
  0x20   : > { %3054 = vmatprep.mubr.msk.f32.mxu1 %vm677_vm0, %v654_v22  ;;  %3339 = vmatpush3.bf16.msra.mxu1 %v3336_v18 }
  0x21   : > { %3349 = vmatprep.subr.bf16.mxu1 %v3348_v23  ;;  %3095 = vmatmul.mubr.msk.f32.gmra.mrb[4].mxu0 %vm677_vm0, %v663_v34 }
  0x22   : > { %3097 = vmatprep.mubr.msk.f32.mxu0 %vm677_vm0, %v664_v35 }
  0x23   : > { %3055 = vmatmul.mubr.msk.f32.gmra.mrb[4].mxu1 %vm677_vm0, %v655_v24 }
  0x24   : > { %3057 = vmatprep.mubr.msk.f32.mxu1 %vm677_vm0, %v656_v25 }
  0x25   : > { %3098 = vmatmul.mubr.msk.f32.gmra.mrb[6].mxu0 %vm677_vm0, %v665_v36 }
  0x27   : > { %3058 = vmatmul.mubr.msk.f32.gmra.mrb[6].mxu1 %vm677_vm0, %v657_v26 }
  0x28   : > { %3068 = vmatprep.mubr.msk.f32.mxu1 %vm677_vm0, %v650_v12 }
  0x2b   : > { %3069 = vmatmul.mubr.msk.f32.vlgmr.msra.gmra.mrb[8].mxu1 %vm677_vm0, %v651_v15 }
  0x2c   : > { %3351 = vmatpush3.bf16.msra.mxu1 %v3348_v23  ;;  %3071 = vmatprep.mubr.msk.f32.mxu1 %vm677_vm0, %v652_v17  ;;  %v3384_v17 = vpack.c.bf16 %v1589_v10, %v1588_v9 }
  0x2d   : > { %3353 = vmatprep.subr.bf16.mxu1 %v3352_v29 }
  0x2f   : > { %3072 = vmatmul.mubr.msk.f32.gmra.mrb[10].mxu1 %vm677_vm0, %v653_v21 }
  0x30   : > { %3074 = vmatprep.mubr.msk.f32.mxu1 %vm677_vm0, %v654_v22  ;;  %3355 = vmatpush3.bf16.msra.mxu1 %v3352_v29 }
  0x31   : > { %3365 = vmatprep.subr.bf16.mxu1 %v3364_v45 }
  0x33   : > { %3075 = vmatmul.mubr.msk.f32.gmra.mrb[12].mxu1 %vm677_vm0, %v655_v24 }
  0x34   : > { %3077 = vmatprep.mubr.msk.f32.mxu1 %vm677_vm0, %v656_v25 }
  0x37   : > { %3078 = vmatmul.mubr.msk.f32.gmra.mrb[14].mxu1 %vm677_vm0, %v657_v26 }
  0x38   : > { %3108 = vmatprep.mubr.msk.f32.mxu1 %vm677_vm0, %v658_v16  ;;  %v3376_v16 = vpack.c.bf16 %v1456_v8, %v1455_v6 }
  0x3b   : > { %3109 = vmatmul.mubr.msk.f32.vlgmr.msra.gmra.mrb[16].mxu1 %vm677_vm0, %v659_v30 }
  0x3c   : > { %3111 = vmatprep.mubr.msk.f32.mxu1 %vm677_vm0, %v660_v31  ;;  %3367 = vmatpush3.bf16.msra.mxu1 %v3364_v45  ;;  %v2783_v31 = vld [vmem:[%s4147_s9] ss:$0 sm:$0xff] }
  0x3d   : > { %3369 = vmatprep.subr.bf16.mxu1 %v3368_v51 }
  0x3f   : > { %3112 = vmatmul.mubr.msk.f32.gmra.mrb[18].mxu1 %vm677_vm0, %v661_v32 }
  0x40   : > { %3114 = vmatprep.mubr.msk.f32.mxu1 %vm677_vm0, %v662_v33  ;;  %3371 = vmatpush3.bf16.msra.mxu1 %v3368_v51 }
  0x41   : > { %3381 = vmatprep.subr.bf16.mxu1 %v3380_v57 }
  0x43   : > { %3115 = vmatmul.mubr.msk.f32.gmra.mrb[20].mxu1 %vm677_vm0, %v663_v34 }
  0x44   : > { %3117 = vmatprep.mubr.msk.f32.mxu1 %vm677_vm0, %v664_v35 }
  0x47   : > { %3118 = vmatmul.mubr.msk.f32.gmra.mrb[22].mxu1 %vm677_vm0, %v665_v36 }
  0xee   : > { %v3772_v58 = vpop.f32.mrb[0].mxu1 }
  0xef   : > { %v3774_v59 = vpop.f32.mrb[1].mxu1 }
  0xf2   : > { %v3776_v60 = vpop.f32.mrb[2].mxu1 }
  0xf3   : > { %v3778_v61 = vpop.f32.mrb[3].mxu1 }
  0xf6   : > { %v3780_v62 = vpop.f32.mrb[4].mxu1 }
  0xf7   : > { %v3782_v63 = vpop.f32.mrb[5].mxu1 }
  0xfa   : > { %v3784_v0 = vpop.f32.mrb[6].mxu1 }
  0xfb   : > { %v3786_v1 = vpop.f32.mrb[7].mxu1 }
  0xfe   : > { %v3070_v3 = vpop.f32.mrb[8].mxu1 }
  0xff   : > { %v898_v4 = vadd.f32 %v3070_v3, %v2765_v2  ;;  %v892_v5 = vpop.f32.mrb[9].mxu1 }
 0x100   : > { %v893_v7 = vadd.f32 %v2765_v2, %v892_v5 }
 0x101   : > { %v3805_v13 = vmax.f32 %v898_v4, 0.0 }
 0x102   : > { %v3803_v11 = vmax.f32 %v893_v7, 0.0  ;;  %v3073_v12 = vpop.f32.mrb[10].mxu1 }
 0x103   : > { %v908_v14 = vadd.f32 %v3073_v12, %v2765_v2  ;;  %v902_v15 = vpop.f32.mrb[11].mxu1 }
 0x104   : > { %v903_v18 = vadd.f32 %v2765_v2, %v902_v15  ;;  %3128 = vmatprep.mubr.msk.f32.mxu0 %vm677_vm0, %v3803_v11  ;;  %3148 = vmatprep.mubr.msk.f32.mxu1 %vm677_vm0, %v3803_v11 }
 0x105   : > { %3129 = vmatmul.mubr.msk.f32.vlgmr.msra.gmra.mrb[8].mxu0 %vm677_vm0, %v3805_v13  ;;  %3149 = vmatmul.mubr.msk.f32.vlgmr.msra.gmra.mrb[24].mxu1 %vm677_vm0, %v3805_v13  ;;  %v3817_v21 = vmax.f32 %v908_v14, 0.0 }
 0x106   : > { %v3815_v19 = vmax.f32 %v903_v18, 0.0  ;;  %v3076_v20 = vpop.f32.mrb[12].mxu1  ;;  %3375 = vmatpush3.bf16.msra.mxu0 %v3372_v54  ;;  %3383 = vmatpush3.bf16.msra.mxu1 %v3380_v57 }
 0x107   : > { %v918_v22 = vadd.f32 %v3076_v20, %v2765_v2  ;;  %v912_v23 = vpop.f32.mrb[13].mxu1  ;;  %3377 = vmatprep.subr.bf16.mxu0 %v3376_v16  ;;  %3385 = vmatprep.subr.bf16.mxu1 %v3384_v17 }
 0x108   : > { %v913_v24 = vadd.f32 %v2765_v2, %v912_v23  ;;  %3131 = vmatprep.mubr.msk.f32.mxu0 %vm677_vm0, %v3815_v19  ;;  %3151 = vmatprep.mubr.msk.f32.mxu1 %vm677_vm0, %v3815_v19 }
 0x109   : > { %3132 = vmatmul.mubr.msk.f32.gmra.mrb[10].mxu0 %vm677_vm0, %v3817_v21  ;;  %3152 = vmatmul.mubr.msk.f32.gmra.mrb[26].mxu1 %vm677_vm0, %v3817_v21  ;;  %v3829_v27 = vmax.f32 %v918_v22, 0.0 }
 0x10a   : > { %v3827_v25 = vmax.f32 %v913_v24, 0.0  ;;  %v3079_v26 = vpop.f32.mrb[14].mxu1  ;;  %3379 = vmatpush3.bf16.msra.mxu0 %v3376_v16  ;;  %3387 = vmatpush3.bf16.msra.mxu1 %v3384_v17 }
 0x10b   : > { %v928_v28 = vadd.f32 %v3079_v26, %v2765_v2  ;;  %v922_v29 = vpop.f32.mrb[15].mxu1 }
 0x10c   : > { %v923_v30 = vadd.f32 %v2765_v2, %v922_v29  ;;  %3134 = vmatprep.mubr.msk.f32.mxu0 %vm677_vm0, %v3827_v25  ;;  %3154 = vmatprep.mubr.msk.f32.mxu1 %vm677_vm0, %v3827_v25  ;;  %v3902_v2 = vpop.f32.mrb[0].mxu0 }
 0x10d   : > { %3135 = vmatmul.mubr.msk.f32.gmra.mrb[12].mxu0 %vm677_vm0, %v3829_v27  ;;  %3155 = vmatmul.mubr.msk.f32.gmra.mrb[28].mxu1 %vm677_vm0, %v3829_v27  ;;  %v3844_v34 = vmax.f32 %v928_v28, 0.0  ;;  %v3904_v3 = vpop.f32.mrb[1].mxu0 }
 0x10e   : > { %v3842_v32 = vmax.f32 %v923_v30, 0.0  ;;  %v3110_v33 = vpop.f32.mrb[16].mxu1  ;;  %v3906_v4 = vpop.f32.mrb[2].mxu0 }
 0x10f   : > { %v1170_v35 = vadd.f32 %v3110_v33, %v2783_v31  ;;  %v1164_v36 = vpop.f32.mrb[17].mxu1  ;;  %v3908_v5 = vpop.f32.mrb[3].mxu0 }
 0x110   : > { %v1165_v37 = vadd.f32 %v2783_v31, %v1164_v36  ;;  %3137 = vmatprep.mubr.msk.f32.mxu0 %vm677_vm0, %v3842_v32  ;;  %3157 = vmatprep.mubr.msk.f32.mxu1 %vm677_vm0, %v3842_v32  ;;  %v3910_v6 = vpop.f32.mrb[4].mxu0 }
 0x111   : > { %3138 = vmatmul.mubr.msk.f32.gmra.mrb[14].mxu0 %vm677_vm0, %v3844_v34  ;;  %3158 = vmatmul.mubr.msk.f32.gmra.mrb[30].mxu1 %vm677_vm0, %v3844_v34  ;;  %v3856_v40 = vmax.f32 %v1170_v35, 0.0  ;;  %v3912_v7 = vpop.f32.mrb[5].mxu0 }
 0x112   : > { %v3854_v38 = vmax.f32 %v1165_v37, 0.0  ;;  %v3113_v39 = vpop.f32.mrb[18].mxu1  ;;  %v3914_v8 = vpop.f32.mrb[6].mxu0 }
 0x113   : > { %v1180_v41 = vadd.f32 %v3113_v39, %v2783_v31  ;;  %v1174_v42 = vpop.f32.mrb[19].mxu1  ;;  %v3916_v9 = vpop.f32.mrb[7].mxu0 }
 0x114   : > { %v1175_v43 = vadd.f32 %v2783_v31, %v1174_v42  ;;  %3168 = vmatprep.mubr.msk.f32.mxu0 %vm677_vm0, %v3854_v38  ;;  %3188 = vmatprep.mubr.msk.f32.mxu1 %vm677_vm0, %v3854_v38 }
 0x115   : > { %v3862_v44 = vmax.f32 %v1180_v41, 0.0  ;;  %3169 = vmatmul.mubr.msk.f32.vlgmr.msra.gmra.mrb[16].mxu0 %vm677_vm0, %v3856_v40  ;;  %3189 = vmatmul.mubr.msk.f32.vlgmr.msra.gmra.mrb[32].mxu1 %vm677_vm0, %v3856_v40 }
 0x116   : > { %v3868_v45 = vmax.f32 %v1175_v43, 0.0  ;;  %v3116_v46 = vpop.f32.mrb[20].mxu1 }
 0x117   : > { %v1190_v47 = vadd.f32 %v3116_v46, %v2783_v31  ;;  %v1184_v48 = vpop.f32.mrb[21].mxu1 }
 0x118   : > { %3191 = vmatprep.mubr.msk.f32.mxu1 %vm677_vm0, %v3868_v45  ;;  %3171 = vmatprep.mubr.msk.f32.mxu0 %vm677_vm0, %v3868_v45  ;;  %v1185_v49 = vadd.f32 %v2783_v31, %v1184_v48 }
 0x119   : > { %3192 = vmatmul.mubr.msk.f32.gmra.mrb[34].mxu1 %vm677_vm0, %v3862_v44  ;;  %v3876_v50 = vmax.f32 %v1190_v47, 0.0  ;;  %3172 = vmatmul.mubr.msk.f32.gmra.mrb[18].mxu0 %vm677_vm0, %v3862_v44 }
 0x11a   : > { %v3880_v51 = vmax.f32 %v1185_v49, 0.0  ;;  %v3119_v52 = vpop.f32.mrb[22].mxu1 }
 0x11b   : > { %v1200_v53 = vadd.f32 %v3119_v52, %v2783_v31  ;;  %v1194_v54 = vpop.f32.mrb[23].mxu1 }
 0x11c   : > { %3194 = vmatprep.mubr.msk.f32.mxu1 %vm677_vm0, %v3880_v51  ;;  %3174 = vmatprep.mubr.msk.f32.mxu0 %vm677_vm0, %v3880_v51  ;;  %v1195_v55 = vadd.f32 %v2783_v31, %v1194_v54 }
 0x11d   : > { %3195 = vmatmul.mubr.msk.f32.gmra.mrb[36].mxu1 %vm677_vm0, %v3876_v50  ;;  %v3888_v56 = vmax.f32 %v1200_v53, 0.0  ;;  %3175 = vmatmul.mubr.msk.f32.gmra.mrb[20].mxu0 %vm677_vm0, %v3876_v50 }
 0x11e   : > { %v3892_v57 = vmax.f32 %v1195_v55, 0.0 }
 0x120   : > { %3197 = vmatprep.mubr.msk.f32.mxu1 %vm677_vm0, %v3892_v57  ;;  %3177 = vmatprep.mubr.msk.f32.mxu0 %vm677_vm0, %v3892_v57 }
 0x121   : > { %3198 = vmatmul.mubr.msk.f32.gmra.mrb[38].mxu1 %vm677_vm0, %v3888_v56  ;;  %3178 = vmatmul.mubr.msk.f32.gmra.mrb[22].mxu0 %vm677_vm0, %v3888_v56 }
 0x1d8   : > { %v3130_v10 = vpop.f32.mrb[8].mxu0  ;;  %v3150_v12 = vpop.f32.mrb[24].mxu1 }
 0x1d9   : > { %v1305_v14 = vpop.f32.mrb[9].mxu0  ;;  %v1414_v15 = vpop.f32.mrb[25].mxu1 }
 0x1da   : > { %v3388_v16 = vpack.c.bf16 %v3150_v12, %v1414_v15  ;;  %1699 = vxpose.xlu0.b32.start [1/8] (short) (narrow) %v1305_v14, 32 }
 0x1dc   : > { %v3133_v17 = vpop.f32.mrb[10].mxu0  ;;  %v3153_v18 = vpop.f32.mrb[26].mxu1  ;;  %3389 = vmatprep.subr.bf16.mxu0 %v3388_v16 }
 0x1dd   : > { %v1315_v20 = vpop.f32.mrb[11].mxu0  ;;  %v1424_v22 = vpop.f32.mrb[27].mxu1  ;;  %3391 = vmatpush3.bf16.msra.mxu0 %v3388_v16 }
 0x1de   : > { %v3392_v23 = vpack.c.bf16 %v3153_v18, %v1424_v22  ;;  %1700 = vxpose.xlu0.b32.cont [2/8] (short) (narrow) %v3130_v10, 32 }
 0x1e0   : > { %v3136_v24 = vpop.f32.mrb[12].mxu0  ;;  %v3156_v26 = vpop.f32.mrb[28].mxu1  ;;  %3393 = vmatprep.subr.bf16.mxu0 %v3392_v23 }
 0x1e1   : > { %v1325_v28 = vpop.f32.mrb[13].mxu0  ;;  %v1434_v29 = vpop.f32.mrb[29].mxu1  ;;  %3395 = vmatpush3.bf16.msra.mxu0 %v3392_v23 }
 0x1e2   : > { %v3396_v30 = vpack.c.bf16 %v3156_v26, %v1434_v29  ;;  %1701 = vxpose.xlu0.b32.cont [3/8] (short) (narrow) %v1315_v20, 32 }
 0x1e4   : > { %v3139_v31 = vpop.f32.mrb[14].mxu0  ;;  %v3159_v33 = vpop.f32.mrb[30].mxu1  ;;  %3397 = vmatprep.subr.bf16.mxu0 %v3396_v30 }
 0x1e5   : > { %v1335_v35 = vpop.f32.mrb[15].mxu0  ;;  %v1444_v36 = vpop.f32.mrb[31].mxu1  ;;  %3399 = vmatpush3.bf16.msra.mxu0 %v3396_v30 }
 0x1e6   : > { %v3400_v37 = vpack.c.bf16 %v3159_v33, %v1444_v36  ;;  %1702 = vxpose.xlu0.b32.cont [4/8] (short) (narrow) %v3133_v17, 32  ;;  %v1696_v33 = vld [vmem:[%s4157_s19 + $0x8] sm:$0xff] }
 0x1e8   : > { %v3170_v39 = vpop.f32.mrb[16].mxu0  ;;  %v3190_v41 = vpop.f32.mrb[32].mxu1  ;;  %3401 = vmatprep.subr.bf16.mxu0 %v3400_v37 }
 0x1e9   : > { %v1547_v42 = vpop.f32.mrb[17].mxu0  ;;  %v1656_v43 = vpop.f32.mrb[33].mxu1  ;;  %3403 = vmatpush3.bf16.msra.mxu0 %v3400_v37 }
 0x1ea   : > { %v3404_v46 = vpack.c.bf16 %v3190_v41, %v1656_v43  ;;  %1703 = vxpose.xlu0.b32.cont [5/8] (short) (narrow) %v1325_v28, 32  ;;  %1829 = vxpose.xlu1.b32.start [1/8] (short) (narrow) %v1547_v42, 32 }
 0x1ec   : > { %v3193_v47 = vpop.f32.mrb[34].mxu1  ;;  %3405 = vmatprep.subr.bf16.mxu1 %v3404_v46  ;;  %v3173_v48 = vpop.f32.mrb[18].mxu0 }
 0x1ed   : > { %v1666_v49 = vpop.f32.mrb[35].mxu1  ;;  %3407 = vmatpush3.bf16.msra.mxu1 %v3404_v46  ;;  %v1557_v52 = vpop.f32.mrb[19].mxu0  ;;  %v1697_v46 = vld [vmem:[%s4157_s19 + $0x10] sm:$0xff] }
 0x1ee   : > { %v3408_v53 = vpack.c.bf16 %v3193_v47, %v1666_v49  ;;  %1704 = vxpose.xlu0.b32.cont [6/8] (short) (narrow) %v3136_v24, 32  ;;  %1830 = vxpose.xlu1.b32.cont [2/8] (short) (narrow) %v3170_v39, 32 }
 0x1f0   : > { %3409 = vmatprep.subr.bf16.mxu1 %v3408_v53  ;;  %v3196_v54 = vpop.f32.mrb[36].mxu1  ;;  %v3176_v55 = vpop.f32.mrb[20].mxu0 }
 0x1f1   : > { %3411 = vmatpush3.bf16.msra.mxu1 %v3408_v53  ;;  %v1676_v10 = vpop.f32.mrb[37].mxu1  ;;  %v1567_v12 = vpop.f32.mrb[21].mxu0 }
 0x1f2   : > { %1705 = vxpose.xlu0.b32.cont [7/8] (short) (narrow) %v1335_v35, 32  ;;  %1831 = vxpose.xlu1.b32.cont [3/8] (short) (narrow) %v1557_v52, 32  ;;  %v3412_v14 = vpack.c.bf16 %v3196_v54, %v1676_v10 }
 0x1f4   : > { %3413 = vmatprep.subr.bf16.mxu1 %v3412_v14  ;;  %v3199_v15 = vpop.f32.mrb[38].mxu1  ;;  %v3179_v16 = vpop.f32.mrb[22].mxu0 }
 0x1f5   : > { %3415 = vmatpush3.bf16.msra.mxu1 %v3412_v14  ;;  %v1686_v17 = vpop.f32.mrb[39].mxu1  ;;  %v1577_v18 = vpop.f32.mrb[23].mxu0 }
 0x1f6   : > { %1706 = vxpose.xlu0.b32.end [8/8] (short) (narrow) %v3139_v31, 32  ;;  %1832 = vxpose.xlu1.b32.cont [4/8] (short) (narrow) %v3173_v48, 32  ;;  %v3416_v20 = vpack.c.bf16 %v3199_v15, %v1686_v17 }
 0x1f8   : > { %3417 = vmatprep.subr.bf16.mxu1 %v3416_v20 }
 0x1f9   : > { %3419 = vmatpush3.bf16.msra.mxu1 %v3416_v20 }
 0x1fa   : > { %1833 = vxpose.xlu1.b32.cont [5/8] (short) (narrow) %v1567_v12, 32 }
 0x1fe   : > { %1834 = vxpose.xlu1.b32.cont [6/8] (short) (narrow) %v3176_v55, 32 }
 0x202   : > { %1835 = vxpose.xlu1.b32.cont [7/8] (short) (narrow) %v1577_v18, 32 }
 0x206   : > { %1836 = vxpose.xlu1.b32.end [8/8] (short) (narrow) %v3179_v16, 32 }
 0x25a   : > { %v1715_v22 = vpop.trf.xlu0 }
 0x25b   : > { %3216 = vmatprep.mubr.msk.f32.mxu0 %vm1731_vm1, %v1715_v22 }
 0x25e   : > { %v1716_v23 = vpop.trf.xlu0 }
 0x25f   : > { %3217 = vmatmul.mubr.msk.f32.vlgmr.msra.gmra.mrb[24].mxu0 %vm1731_vm1, %v1716_v23 }
 0x262   : > { %v1717_v24 = vpop.trf.xlu0 }
 0x263   : > { %3219 = vmatprep.mubr.msk.f32.mxu0 %vm1731_vm1, %v1717_v24 }
 0x266   : > { %v1718_v26 = vpop.trf.xlu0 }
 0x267   : > { %3220 = vmatmul.mubr.msk.f32.gmra.mrb[26].mxu0 %vm1731_vm1, %v1718_v26 }
 0x268   : > { %3252 = vmatprep.mubr.msk.f32.mxu0 %vm677_vm0, %v3803_v11  ;;  %v1695_v11 = vld [vmem:[%s4157_s19] sm:$0xff] }
 0x26a   : > { %v1845_v28 = vpop.trf.xlu1 }
 0x26b   : > { %3238 = vmatprep.mubr.msk.f32.mxu1 %vm1731_vm1, %v1845_v28 }
 0x26e   : > { %v1846_v29 = vpop.trf.xlu1 }
 0x26f   : > { %3239 = vmatmul.mubr.msk.f32.vlgmr.msra.gmra.mrb[40].mxu1 %vm1731_vm1, %v1846_v29 }
 0x272   : > { %v1847_v30 = vpop.trf.xlu1 }
 0x273   : > { %3241 = vmatprep.mubr.msk.f32.mxu1 %vm1731_vm1, %v1847_v30 }
 0x276   : > { %v1848_v31 = vpop.trf.xlu1 }
 0x277   : > { %3242 = vmatmul.mubr.msk.f32.gmra.mrb[42].mxu1 %vm1731_vm1, %v1848_v31 }
 0x278   : > { %3272 = vmatprep.mubr.msk.f32.mxu1 %vm677_vm0, %v3854_v38  ;;  %v1698_v38 = vld [vmem:[%s4157_s19 + $0x18] sm:$0xff] }
 0x332   : > { %v3218_v35 = vpop.f32.mrb[24].mxu0 }
 0x333   : > { %v1816_v36 = vadd.f32 %v3218_v35, %v1696_v33  ;;  %v1810_v37 = vpop.f32.mrb[25].mxu0 }
 0x334   : > { %v1811_v39 = vadd.f32 %v1810_v37, %v1695_v11 }
 0x335   : > { %v1959_v41 = vsel %vm677_vm0, %v1816_v36, -inf }
 0x336   : > { %v1958_v42 = vsel %vm677_vm0, %v1811_v39, -inf }
 0x337   : > { %v1962_v43 = vmax.f32 %v1958_v42, %v1959_v41 }
 0x33a   : > { %v3221_v47 = vpop.f32.mrb[26].mxu0 }
 0x33b   : > { %v1826_v48 = vadd.f32 %v3221_v47, %v1698_v38  ;;  %v1820_v49 = vpop.f32.mrb[27].mxu0 }
 0x33c   : > { %v1821_v52 = vadd.f32 %v1820_v49, %v1697_v46 }
 0x33d   : > { %v1961_v53 = vsel %vm677_vm0, %v1826_v48, -inf }
 0x33e   : > { %v1960_v54 = vsel %vm677_vm0, %v1821_v52, -inf }
 0x33f   : > { %v1963_v55 = vmax.f32 %v1960_v54, %v1961_v53 }
 0x341   : > { %v1964_v10 = vmax.f32 %v1962_v43, %v1963_v55 }
 0x342   : > { %v3240_v12 = vpop.f32.mrb[40].mxu1 }
 0x343   : > { %v1965_v14 = vrot.slane %v1964_v10, 4  ;;  %v1945_v15 = vadd.f32 %v3240_v12, %v1696_v33  ;;  %v1939_v16 = vpop.f32.mrb[41].mxu1 }
 0x344   : > { %v1940_v17 = vadd.f32 %v1939_v16, %v1695_v11 }
 0x345   : > { %v1966_v18 = vmax.f32 %v1964_v10, %v1965_v14  ;;  %v2002_v20 = vsel %vm677_vm0, %v1945_v15, -inf }
 0x346   : > { %v2001_v22 = vsel %vm677_vm0, %v1940_v17, -inf }
 0x347   : > { %v1967_v23 = vrot.slane %v1966_v18, 2  ;;  %v2005_v24 = vmax.f32 %v2001_v22, %v2002_v20 }
 0x349   : > { %v1968_v26 = vmax.f32 %v1966_v18, %v1967_v23 }
 0x34a   : > { %v3243_v28 = vpop.f32.mrb[42].mxu1 }
 0x34b   : > { %v1969_v29 = vrot.slane %v1968_v26, 1  ;;  %v1955_v30 = vadd.f32 %v3243_v28, %v1698_v38  ;;  %v1949_v31 = vpop.f32.mrb[43].mxu1 }
 0x34c   : > { %v1950_v35 = vadd.f32 %v1949_v31, %v1697_v46 }
 0x34d   : > { %v1970_v37 = vmax.f32 %v1968_v26, %v1969_v29  ;;  %v2004_v41 = vsel %vm677_vm0, %v1955_v30, -inf }
 0x34e   : > { %v2003_v33 = vsel %vm677_vm0, %v1950_v35, -inf }
 0x34f   : > { %v1971_v42 = vsub.f32 %v1811_v39, %v1970_v37  ;;  %v1972_v11 = vsub.f32 %v1816_v36, %v1970_v37  ;;  %v1973_v43 = vsub.f32 %v1821_v52, %v1970_v37  ;;  %v1974_v47 = vsub.f32 %v1826_v48, %v1970_v37 }
 0x350   : > { %v2006_v49 = vmax.f32 %v2003_v33, %v2004_v41 }
 0x351   : > { %v1975_v53 = vmul.f32 1.442695, %v1971_v42  ;;  %v1977_v54 = vmul.f32 1.442695, %v1972_v11  ;;  %v1979_v55 = vmul.f32 1.442695, %v1973_v43 }
 0x352   : > { %v1981_v10 = vmul.f32 1.442695, %v1974_v47  ;;  %v2007_v12 = vmax.f32 %v2005_v24, %v2006_v49 }
 0x353   : > { %3469 = vpow2.f32 %v1975_v53 }
 0x354   : > { %3471 = vpow2.f32 %v1977_v54  ;;  %v2008_v38 = vrot.slane %v2007_v12, 4 }
 0x355   : > { %3473 = vpow2.f32 %v1979_v55 }
 0x356   : > { %3475 = vpow2.f32 %v1981_v10  ;;  %v2009_v46 = vmax.f32 %v2007_v12, %v2008_v38 }
 0x358   : > { %v2010_v14 = vrot.slane %v2009_v46, 2 }
 0x35a   : > { %v2011_v16 = vmax.f32 %v2009_v46, %v2010_v14 }
 0x35c   : > { %v2012_v18 = vrot.slane %v2011_v16, 1 }
 0x35d   : > { %v3470_v20 = vpop.eup %3469 }
 0x35e   : > { %v3472_v39 = vpop.eup %3471  ;;  %v1983_v36 = vsel %vm677_vm0, %v3470_v20, 0.0  ;;  %v2013_v48 = vmax.f32 %v2011_v16, %v2012_v18 }
 0x35f   : > { %v3474_v52 = vpop.eup %3473  ;;  %v1984_v22 = vsel %vm677_vm0, %v3472_v39, 0.0 }
 0x360   : > { %v3476_v23 = vpop.eup %3475  ;;  %v1985_v26 = vadd.f32 %v1984_v22, %v1983_v36  ;;  %v2014_v24 = vsub.f32 %v1940_v17, %v2013_v48  ;;  %v2015_v28 = vsub.f32 %v1945_v15, %v2013_v48  ;;  %v1986_v29 = vsel %vm677_vm0, %v3474_v52, 0.0 }
 0x361   : > { %v2016_v31 = vsub.f32 %v1950_v35, %v2013_v48  ;;  %v2017_v37 = vsub.f32 %v1955_v30, %v2013_v48  ;;  %v1988_v11 = vsel %vm677_vm0, %v3476_v23, 0.0 }
 0x362   : > { %v1987_v41 = vadd.f32 %v1986_v29, %v1985_v26  ;;  %v2018_v33 = vmul.f32 1.442695, %v2014_v24  ;;  %v2020_v42 = vmul.f32 1.442695, %v2015_v28 }
 0x363   : > { %v2022_v43 = vmul.f32 1.442695, %v2016_v31  ;;  %v2024_v47 = vmul.f32 1.442695, %v2017_v37 }
 0x364   : > { %v1989_v49 = vadd.f32 %v1988_v11, %v1987_v41  ;;  %3477 = vpow2.f32 %v2018_v33 }
 0x365   : > { %3479 = vpow2.f32 %v2020_v42 }
 0x366   : > { %v1990_v53 = vrot.slane %v1989_v49, 4  ;;  %3481 = vpow2.f32 %v2022_v43 }
 0x367   : > { %3483 = vpow2.f32 %v2024_v47 }
 0x368   : > { %v1991_v54 = vadd.f32 %v1990_v53, %v1989_v49 }
 0x36a   : > { %v1992_v17 = vrot.slane %v1991_v54, 2 }
 0x36c   : > { %v1993_v15 = vadd.f32 %v1992_v17, %v1991_v54 }
 0x36e   : > { %v3478_v55 = vpop.eup %3477  ;;  %v1994_v10 = vrot.slane %v1993_v15, 1 }
 0x36f   : > { %v3480_v35 = vpop.eup %3479  ;;  %v2026_v30 = vsel %vm677_vm0, %v3478_v55, 0.0 }
 0x370   : > { %v3482_v12 = vpop.eup %3481  ;;  %v1995_v38 = vadd.f32 %v1994_v10, %v1993_v15  ;;  %v2027_v46 = vsel %vm677_vm0, %v3480_v35, 0.0 }
 0x371   : > { %v3484_v14 = vpop.eup %3483  ;;  %v2028_v16 = vadd.f32 %v2027_v46, %v2026_v30  ;;  %v2029_v18 = vsel %vm677_vm0, %v3482_v12, 0.0  ;;  %v2152_v30 = vld [vmem:[%s4152_s14 + $0x18] sm:$0xff] }
 0x372   : > { %3485 = vrcp.f32 %v1995_v38  ;;  %v2031_v48 = vsel %vm677_vm0, %v3484_v14, 0.0 }
 0x373   : > { %v2030_v36 = vadd.f32 %v2029_v18, %v2028_v16 }
 0x375   : > { %v2032_v22 = vadd.f32 %v2031_v48, %v2030_v36 }
 0x377   : > { %v2033_v26 = vrot.slane %v2032_v22, 4 }
 0x379   : > { %v2034_v24 = vadd.f32 %v2033_v26, %v2032_v22 }
 0x37b   : > { %v2035_v28 = vrot.slane %v2034_v24, 2 }
 0x37c   : > { %v3486_v29 = vpop.eup %3485 }
 0x37d   : > { %v2036_v31 = vadd.f32 %v2035_v28, %v2034_v24  ;;  %v1997_v37 = vmul.f32 %v3486_v29, %v3470_v20  ;;  %v1998_v41 = vmul.f32 %v3486_v29, %v3472_v39  ;;  %v1999_v33 = vmul.f32 %v3486_v29, %v3474_v52 }
 0x37e   : > { %v2000_v42 = vmul.f32 %v3486_v29, %v3476_v23 }
 0x37f   : > { %v2037_v11 = vrot.slane %v2036_v31, 1  ;;  %v3428_v43 = vpack.c.bf16 %v1998_v41, %v1997_v37 }
 0x380   : > { %v3432_v47 = vpack.c.bf16 %v2000_v42, %v1999_v33 }
 0x381   : > { %v2038_v49 = vadd.f32 %v2037_v11, %v2036_v31  ;;  %3429 = vmatprep.subr.bf16.mxu1 %v3428_v43 }
 0x382   : > { %3431 = vmatpush3.bf16.msra.mxu1 %v3428_v43 }
 0x383   : > { %3487 = vrcp.f32 %v2038_v49  ;;  %3433 = vmatprep.subr.bf16.mxu1 %v3432_v47 }
 0x386   : > { %3435 = vmatpush3.bf16.msra.mxu1 %v3432_v47 }
 0x389   : > { %3273 = vmatmul.mubr.msk.f32.vlgmr.msra.gmra.mrb[44].mxu1 %vm677_vm0, %v3856_v40  ;;  %v2258_v40 = vld [vmem:[%s4153_s15] sm:$0xff] }
 0x38a   : > { %3275 = vmatprep.mubr.msk.f32.mxu1 %vm677_vm0, %v3868_v45 }
 0x38d   : > { %v3488_v53 = vpop.eup %3487  ;;  %3276 = vmatmul.mubr.msk.f32.gmra.mrb[46].mxu1 %vm677_vm0, %v3862_v44  ;;  %v2259_v44 = vld [vmem:[%s4153_s15 + $0x8] sm:$0xff] }
 0x38e   : > { %3278 = vmatprep.mubr.msk.f32.mxu1 %vm677_vm0, %v3880_v51  ;;  %v2040_v20 = vmul.f32 %v3488_v53, %v3478_v55  ;;  %v2041_v39 = vmul.f32 %v3488_v53, %v3480_v35  ;;  %v2042_v52 = vmul.f32 %v3488_v53, %v3482_v12  ;;  %v2043_v23 = vmul.f32 %v3488_v53, %v3484_v14  ;;  %v2261_v51 = vld [vmem:[%s4153_s15 + $0x18] sm:$0xff]  ;;  %v2151_v35 = vld [vmem:[%s4152_s14 + $0x10] sm:$0xff] }
 0x38f   : > { %v3436_v45 = vpack.c.bf16 %v2259_v44, %v2258_v40  ;;  %v3448_v14 = vpack.c.bf16 %v2152_v30, %v2151_v35 }
 0x390   : > { %v3420_v54 = vpack.c.bf16 %v2041_v39, %v2040_v20  ;;  %v3424_v17 = vpack.c.bf16 %v2043_v23, %v2042_v52 }
 0x391   : > { %3279 = vmatmul.mubr.msk.f32.gmra.mrb[48].mxu1 %vm677_vm0, %v3876_v50  ;;  %v2260_v50 = vld [vmem:[%s4153_s15 + $0x10] sm:$0xff] }
 0x392   : > { %3421 = vmatprep.subr.bf16.mxu0 %v3420_v54  ;;  %3281 = vmatprep.mubr.msk.f32.mxu1 %vm677_vm0, %v3892_v57  ;;  %v3440_v15 = vpack.c.bf16 %v2261_v51, %v2260_v50 }
 0x393   : > { %3423 = vmatpush3.bf16.msra.mxu0 %v3420_v54 }
 0x394   : > { %3425 = vmatprep.subr.bf16.mxu0 %v3424_v17 }
 0x395   : > { %3282 = vmatmul.mubr.msk.f32.gmra.mrb[50].mxu1 %vm677_vm0, %v3888_v56 }
 0x397   : > { %3427 = vmatpush3.bf16.msra.mxu0 %v3424_v17 }
 0x398   : > { %3437 = vmatprep.subr.bf16.mxu0 %v3436_v45 }
 0x39a   : > { %3253 = vmatmul.mubr.msk.f32.vlgmr.msra.gmra.mrb[28].mxu0 %vm677_vm0, %v3805_v13  ;;  %v2149_v13 = vld [vmem:[%s4152_s14] sm:$0xff] }
 0x39b   : > { %3255 = vmatprep.mubr.msk.f32.mxu0 %vm677_vm0, %v3815_v19  ;;  %3439 = vmatpush3.bf16.msra.mxu0 %v3436_v45  ;;  %v2150_v19 = vld [vmem:[%s4152_s14 + $0x8] sm:$0xff] }
 0x39c   : > { %3441 = vmatprep.subr.bf16.mxu0 %v3440_v15 }
 0x39e   : > { %3256 = vmatmul.mubr.msk.f32.gmra.mrb[30].mxu0 %vm677_vm0, %v3817_v21  ;;  %v3444_v21 = vpack.c.bf16 %v2150_v19, %v2149_v13 }
 0x39f   : > { %3258 = vmatprep.mubr.msk.f32.mxu0 %vm677_vm0, %v3827_v25  ;;  %3443 = vmatpush3.bf16.msra.mxu0 %v3440_v15  ;;  %v2774_v25 = vld [vmem:[%s4146_s8] ss:$0 sm:$0xff] }
 0x3a0   : > { %3445 = vmatprep.subr.bf16.mxu0 %v3444_v21  ;;  %v1051_v55 = vadd.f32 %v2774_v25, %v3908_v5  ;;  %v1061_v16 = vadd.f32 %v2774_v25, %v3912_v7  ;;  %v1076_v26 = vadd.f32 %v3914_v8, %v2774_v25  ;;  %v2756_v7 = vld [vmem:[%s4170_s4] ss:$0 sm:$0xff] }
 0x3a1   : > { %v774_v8 = vadd.f32 %v3772_v58, %v2756_v7  ;;  %v784_v53 = vadd.f32 %v3776_v60, %v2756_v7  ;;  %v779_v39 = vadd.f32 %v2756_v7, %v3778_v61  ;;  %v794_v17 = vadd.f32 %v3780_v62, %v2756_v7 }
 0x3a2   : > { %3259 = vmatmul.mubr.msk.f32.gmra.mrb[32].mxu0 %vm677_vm0, %v3829_v27  ;;  %v1046_v27 = vadd.f32 %v3902_v2, %v2774_v25  ;;  %v1083_v24 = vmax.f32 %v1061_v16, 0.0  ;;  %v1086_v41 = vmax.f32 %v1076_v26, 0.0  ;;  %v789_v44 = vadd.f32 %v2756_v7, %v3782_v63 }
 0x3a3   : > { %3261 = vmatprep.mubr.msk.f32.mxu0 %vm677_vm0, %v3842_v32  ;;  %v1041_v32 = vadd.f32 %v2774_v25, %v3904_v3  ;;  %v1066_v3 = vadd.f32 %v3910_v6, %v2774_v25  ;;  %v1071_v6 = vadd.f32 %v2774_v25, %v3916_v9  ;;  %v769_v9 = vadd.f32 %v2756_v7, %v3774_v59 }
 0x3a4   : > { %v1080_v56 = vmax.f32 %v1046_v27, 0.0  ;;  %v808_v49 = vmax.f32 %v774_v8, 0.0  ;;  %v810_v59 = vmax.f32 %v784_v53, 0.0  ;;  %v809_v40 = vmax.f32 %v779_v39, 0.0 }
 0x3a5   : > { %v1079_v57 = vmax.f32 %v1041_v32, 0.0  ;;  %v1084_v22 = vmax.f32 %v1066_v3, 0.0  ;;  %v1085_v33 = vmax.f32 %v1071_v6, 0.0  ;;  %v807_v20 = vmax.f32 %v769_v9, 0.0 }
 0x3a6   : > { %3262 = vmatmul.mubr.msk.f32.gmra.mrb[34].mxu0 %vm677_vm0, %v3844_v34  ;;  %v1056_v34 = vadd.f32 %v3906_v4, %v2774_v25  ;;  %v1081_v4 = vmax.f32 %v1051_v55, 0.0  ;;  %v812_v51 = vmax.f32 %v794_v17, 0.0  ;;  %v804_v15 = vadd.f32 %v3784_v0, %v2756_v7 }
 0x3a7   : > { %v811_v13 = vmax.f32 %v789_v44, 0.0  ;;  %v799_v19 = vadd.f32 %v2756_v7, %v3786_v1  ;;  %v2864_v1 = vld [vmem:[%s4154_s16] ss:$0 sm:$0xff] }
 0x3a8   : > { %v1082_v46 = vmax.f32 %v1056_v34, 0.0  ;;  %v814_v27 = vmax.f32 %v804_v15, 0.0 }
 0x3a9   : > { %v813_v32 = vmax.f32 %v799_v19, 0.0 }
 0x45c   : > { %v3274_v10 = vpop.f32.mrb[44].mxu1 }
 0x45d   : > { %v2225_v12 = vadd.f32 %v3274_v10, %v1080_v56  ;;  %v2219_v38 = vpop.f32.mrb[45].mxu1 }
 0x45e   : > { %v2220_v2 = vadd.f32 %v2219_v38, %v1079_v57 }
 0x460   : > { %v3277_v5 = vpop.f32.mrb[46].mxu1  ;;  %3292 = vmatprep.mubr.msk.f32.mxu0 %vm677_vm0, %v2220_v2 }
 0x461   : > { %v2235_v18 = vadd.f32 %v3277_v5, %v1082_v46  ;;  %v2229_v36 = vpop.f32.mrb[47].mxu1  ;;  %3293 = vmatmul.mubr.msk.f32.vlgmr.msra.gmra.mrb[36].mxu0 %vm677_vm0, %v2225_v12 }
 0x462   : > { %v2230_v48 = vadd.f32 %v2229_v36, %v1081_v4  ;;  %3447 = vmatpush3.bf16.msra.mxu0 %v3444_v21 }
 0x463   : > { %3449 = vmatprep.subr.bf16.mxu0 %v3448_v14 }
 0x464   : > { %v3280_v28 = vpop.f32.mrb[48].mxu1  ;;  %3295 = vmatprep.mubr.msk.f32.mxu0 %vm677_vm0, %v2230_v48 }
 0x465   : > { %v2245_v29 = vadd.f32 %v3280_v28, %v1084_v22  ;;  %v2239_v31 = vpop.f32.mrb[49].mxu1  ;;  %3296 = vmatmul.mubr.msk.f32.gmra.mrb[38].mxu0 %vm677_vm0, %v2235_v18 }
 0x466   : > { %v2240_v37 = vadd.f32 %v2239_v31, %v1083_v24  ;;  %3451 = vmatpush3.bf16.msra.mxu0 %v3448_v14 }
 0x468   : > { %v3283_v42 = vpop.f32.mrb[50].mxu1  ;;  %3298 = vmatprep.mubr.msk.f32.mxu0 %vm677_vm0, %v2240_v37 }
 0x469   : > { %v2255_v11 = vadd.f32 %v3283_v42, %v1086_v41  ;;  %v2249_v43 = vpop.f32.mrb[51].mxu1  ;;  %3299 = vmatmul.mubr.msk.f32.gmra.mrb[40].mxu0 %vm677_vm0, %v2245_v29 }
 0x46a   : > { %v2250_v47 = vadd.f32 %v2249_v43, %v1085_v33 }
 0x46c   : > { %3301 = vmatprep.mubr.msk.f32.mxu0 %vm677_vm0, %v2250_v47 }
 0x46d   : > { %v3254_v58 = vpop.f32.mrb[28].mxu0  ;;  %3302 = vmatmul.mubr.msk.f32.gmra.mrb[42].mxu0 %vm677_vm0, %v2255_v11 }
 0x46e   : > { %v2116_v52 = vadd.f32 %v3254_v58, %v808_v49  ;;  %v2110_v23 = vpop.f32.mrb[29].mxu0 }
 0x46f   : > { %v2111_v54 = vadd.f32 %v2110_v23, %v807_v20 }
 0x471   : > { %v3257_v45 = vpop.f32.mrb[30].mxu0  ;;  %3312 = vmatprep.mubr.msk.f32.mxu0 %vm677_vm0, %v2111_v54 }
 0x472   : > { %v2126_v60 = vadd.f32 %v3257_v45, %v810_v59  ;;  %v2120_v50 = vpop.f32.mrb[31].mxu0  ;;  %3313 = vmatmul.mubr.msk.f32.vlgmr.msra.gmra.mrb[36].mxu0 %vm677_vm0, %v2116_v52 }
 0x473   : > { %v2121_v61 = vadd.f32 %v2120_v50, %v809_v40 }
 0x475   : > { %v3260_v21 = vpop.f32.mrb[32].mxu0  ;;  %3315 = vmatprep.mubr.msk.f32.mxu0 %vm677_vm0, %v2121_v61 }
 0x476   : > { %v2136_v62 = vadd.f32 %v3260_v21, %v812_v51  ;;  %v2130_v25 = vpop.f32.mrb[33].mxu0  ;;  %3316 = vmatmul.mubr.msk.f32.gmra.mrb[38].mxu0 %vm677_vm0, %v2126_v60 }
 0x477   : > { %v2131_v63 = vadd.f32 %v2130_v25, %v811_v13 }
 0x479   : > { %v3263_v56 = vpop.f32.mrb[34].mxu0  ;;  %3318 = vmatprep.mubr.msk.f32.mxu0 %vm677_vm0, %v2131_v63 }
 0x47a   : > { %v2146_v34 = vadd.f32 %v3263_v56, %v814_v27  ;;  %v2140_v57 = vpop.f32.mrb[35].mxu0  ;;  %3319 = vmatmul.mubr.msk.f32.gmra.mrb[40].mxu0 %vm677_vm0, %v2136_v62 }
 0x47b   : > { %v2141_v0 = vadd.f32 %v2140_v57, %v813_v32 }
 0x47d   : > { %3321 = vmatprep.mubr.msk.f32.mxu0 %vm677_vm0, %v2141_v0 }
 0x47e   : > { %3322 = vmatmul.mubr.msk.f32.gmra.mrb[42].mxu0 %vm677_vm0, %v2146_v34 }
 0x545   : > { %v3314_v55 = vpop.f32.mrb[36].mxu0 }
 0x546   : > { %v2528_v10 = vadd.f32 %v3314_v55, %v2864_v1  ;;  %v2481_v35 = vpop.f32.mrb[37].mxu0 }
 0x547   : > { %v2527_v30 = vadd.f32 %v2864_v1, %v2481_v35 }
 0x548   : > { %v2538_v12 = vsel %vm677_vm0, %v2528_v10, 0.0 }
 0x549   : > { %2539 = vadd.xlane.f32.xlu1 %v2538_v12  ;;  %v3317_v38 = vpop.f32.mrb[38].mxu0  ;;  %v2535_v2 = vsel %vm677_vm0, %v2527_v30, 0.0 }
 0x54a   : > { %v2530_v46 = vadd.f32 %v3317_v38, %v2864_v1  ;;  %2536 = vadd.xlane.f32.xlu0 %v2535_v2  ;;  %v2491_v3 = vpop.f32.mrb[39].mxu0 }
 0x54b   : > { %v2529_v14 = vadd.f32 %v2864_v1, %v2491_v3 }
 0x54c   : > { %v2544_v4 = vsel %vm677_vm0, %v2530_v46, 0.0 }
 0x54d   : > { %2545 = vadd.xlane.f32.xlu1 %v2544_v4  ;;  %v3320_v16 = vpop.f32.mrb[40].mxu0  ;;  %v2541_v48 = vsel %vm677_vm0, %v2529_v14, 0.0 }
 0x54e   : > { %v2501_v5 = vpop.f32.mrb[41].mxu0  ;;  %v2532_v36 = vadd.f32 %v3320_v16, %v2864_v1 }
 0x54f   : > { %v2531_v18 = vadd.f32 %v2864_v1, %v2501_v5 }
 0x550   : > { %v2550_v7 = vsel %vm677_vm0, %v2532_v36, 0.0 }
 0x551   : > { %2542 = vadd.xlane.f32.xlu1 %v2541_v48  ;;  %v3323_v22 = vpop.f32.mrb[42].mxu0  ;;  %v2547_v26 = vsel %vm677_vm0, %v2531_v18, 0.0 }
 0x552   : > { %2548 = vadd.xlane.f32.xlu0 %v2547_v26  ;;  %v2511_v24 = vpop.f32.mrb[43].mxu0  ;;  %v2534_v28 = vadd.f32 %v3323_v22, %v2864_v1  ;;  %v2865_v26 = vld [vmem:[%s4155_s17] ss:$0 sm:$0xff] }
 0x553   : > { %v2533_v6 = vadd.f32 %v2864_v1, %v2511_v24 }
 0x554   : > { %v2556_v31 = vsel %vm677_vm0, %v2534_v28, 0.0 }
 0x555   : > { %2551 = vadd.xlane.f32.xlu1 %v2550_v7  ;;  %v2553_v29 = vsel %vm677_vm0, %v2533_v6, 0.0 }
 0x556   : > { %2554 = vadd.xlane.f32.xlu0 %v2553_v29 }
 0x559   : > { %2557 = vadd.xlane.f32.xlu1 %v2556_v31 }
 0x5d6   : > { %v2540_v37 = vpop.xlane.xlu1 %2539 }
 0x5d7   : > { %v2561_v41 = vmul.f32 0.03125, %v2540_v37  ;;  %v2537_v8 = vpop.xlane.xlu0 %2536  ;;  %v2866_v37 = vld [vmem:[%s4156_s18] ss:$0 sm:$0xff] }
 0x5d8   : > { %v2560_v33 = vmul.f32 0.03125, %v2537_v8 }
 0x5d9   : > { %v4059_v42 = vsub.f32 %v2528_v10, %v2561_v41 }
 0x5da   : > { %v4061_v9 = vsub.f32 %v2527_v30, %v2560_v33  ;;  %v2546_v11 = vpop.xlane.xlu1 %2545 }
 0x5db   : > { %v2563_v43 = vmul.f32 0.03125, %v2546_v11  ;;  %v2577_v47 = vmul.f32 %v4059_v42, %v4059_v42 }
 0x5dc   : > { %v2576_v49 = vmul.f32 %v4061_v9, %v4061_v9 }
 0x5dd   : > { %v4067_v53 = vsub.f32 %v2530_v46, %v2563_v43  ;;  %v2587_v20 = vsel %vm677_vm0, %v2577_v47, 0.0 }
 0x5de   : > { %v2543_v39 = vpop.xlane.xlu1 %2542  ;;  %2588 = vadd.xlane.f32.xlu1 %v2587_v20  ;;  %v2584_v58 = vsel %vm677_vm0, %v2576_v49, 0.0 }
 0x5df   : > { %v2562_v52 = vmul.f32 0.03125, %v2543_v39  ;;  %v2549_v23 = vpop.xlane.xlu0 %2548  ;;  %2585 = vadd.xlane.f32.xlu0 %v2584_v58  ;;  %v2579_v54 = vmul.f32 %v4067_v53, %v4067_v53 }
 0x5e0   : > { %v2564_v59 = vmul.f32 0.03125, %v2549_v23 }
 0x5e1   : > { %v4073_v17 = vsub.f32 %v2529_v14, %v2562_v52  ;;  %v2593_v40 = vsel %vm677_vm0, %v2579_v54, 0.0 }
 0x5e2   : > { %v4076_v44 = vsub.f32 %v2531_v18, %v2564_v59  ;;  %v2552_v45 = vpop.xlane.xlu1 %2551  ;;  %2594 = vadd.xlane.f32.xlu1 %v2593_v40 }
 0x5e3   : > { %v2565_v60 = vmul.f32 0.03125, %v2552_v45  ;;  %v2555_v50 = vpop.xlane.xlu0 %2554  ;;  %v2578_v61 = vmul.f32 %v4073_v17, %v4073_v17 }
 0x5e4   : > { %v2566_v51 = vmul.f32 0.03125, %v2555_v50  ;;  %v2580_v19 = vmul.f32 %v4076_v44, %v4076_v44 }
 0x5e5   : > { %v4080_v15 = vsub.f32 %v2532_v36, %v2565_v60  ;;  %v2590_v13 = vsel %vm677_vm0, %v2578_v61, 0.0 }
 0x5e6   : > { %v4085_v21 = vsub.f32 %v2533_v6, %v2566_v51  ;;  %v2558_v62 = vpop.xlane.xlu1 %2557  ;;  %2591 = vadd.xlane.f32.xlu0 %v2590_v13  ;;  %v2596_v56 = vsel %vm677_vm0, %v2580_v19, 0.0 }
 0x5e7   : > { %v2567_v25 = vmul.f32 0.03125, %v2558_v62  ;;  %v2581_v63 = vmul.f32 %v4080_v15, %v4080_v15 }
 0x5e8   : > { %v2582_v34 = vmul.f32 %v4085_v21, %v4085_v21 }
 0x5e9   : > { %v4089_v27 = vsub.f32 %v2534_v28, %v2567_v25  ;;  %v2599_v32 = vsel %vm677_vm0, %v2581_v63, 0.0 }
 0x5ea   : > { %2600 = vadd.xlane.f32.xlu1 %v2599_v32  ;;  %2597 = vadd.xlane.f32.xlu0 %v2596_v56  ;;  %v2602_v1 = vsel %vm677_vm0, %v2582_v34, 0.0 }
 0x5eb   : > { %v2583_v57 = vmul.f32 %v4089_v27, %v4089_v27 }
 0x5ed   : > { %v2605_v0 = vsel %vm677_vm0, %v2583_v57, 0.0 }
 0x5ee   : > { %2606 = vadd.xlane.f32.xlu1 %v2605_v0  ;;  %2603 = vadd.xlane.f32.xlu0 %v2602_v1 }
 0x66b   : > { %v2589_v55 = vpop.xlane.xlu1 %2588 }
 0x66c   : > { %v2609_v10 = vmul.f32 0.03125, %v2589_v55  ;;  %v2586_v35 = vpop.xlane.xlu0 %2585 }
 0x66d   : > { %v2608_v30 = vmul.f32 0.03125, %v2586_v35 }
 0x66e   : > { %v2617_v12 = vadd.f32 1e-05, %v2609_v10 }
 0x66f   : > { %v2616_v38 = vadd.f32 1e-05, %v2608_v30  ;;  %v2595_v2 = vpop.xlane.xlu1 %2594 }
 0x670   : > { %3489 = vrsqrt.f32 %v2617_v12  ;;  %v2611_v46 = vmul.f32 0.03125, %v2595_v2 }
 0x671   : > { %3491 = vrsqrt.f32 %v2616_v38 }
 0x672   : > { %v2619_v3 = vadd.f32 1e-05, %v2611_v46 }
 0x673   : > { %v2592_v14 = vpop.xlane.xlu0 %2591 }
 0x674   : > { %3493 = vrsqrt.f32 %v2619_v3  ;;  %v2610_v4 = vmul.f32 0.03125, %v2592_v14 }
 0x676   : > { %v2618_v16 = vadd.f32 1e-05, %v2610_v4 }
 0x677   : > { %v2601_v5 = vpop.xlane.xlu1 %2600  ;;  %v2598_v18 = vpop.xlane.xlu0 %2597 }
 0x678   : > { %3495 = vrsqrt.f32 %v2618_v16  ;;  %v2613_v36 = vmul.f32 0.03125, %v2601_v5  ;;  %v2612_v48 = vmul.f32 0.03125, %v2598_v18 }
 0x67a   : > { %v3490_v22 = vpop.eup %3489  ;;  %v2621_v24 = vadd.f32 1e-05, %v2613_v36  ;;  %v2620_v6 = vadd.f32 1e-05, %v2612_v48 }
 0x67b   : > { %v3492_v28 = vpop.eup %3491  ;;  %v2633_v7 = vmul.f32 %v3490_v22, %v4059_v42  ;;  %v2607_v29 = vpop.xlane.xlu1 %2606 }
 0x67c   : > { %v2604_v31 = vpop.xlane.xlu0 %2603  ;;  %v2632_v41 = vmul.f32 %v3492_v28, %v4061_v9  ;;  %3497 = vrsqrt.f32 %v2621_v24  ;;  %v2615_v8 = vmul.f32 0.03125, %v2607_v29 }
 0x67d   : > { %v2614_v33 = vmul.f32 0.03125, %v2604_v31  ;;  %v2648_v11 = vmul.f32 %v2865_v26, %v2633_v7  ;;  %3499 = vrsqrt.f32 %v2620_v6 }
 0x67e   : > { %v3494_v43 = vpop.eup %3493  ;;  %v2647_v42 = vmul.f32 %v2865_v26, %v2632_v41  ;;  %v2623_v47 = vadd.f32 1e-05, %v2615_v8 }
 0x67f   : > { %v2622_v49 = vadd.f32 1e-05, %v2614_v33  ;;  %v2663_v20 = vadd.f32 %v2866_v37, %v2648_v11  ;;  %v2635_v9 = vmul.f32 %v3494_v43, %v4067_v53 }
 0x680   : > { %v2662_v39 = vadd.f32 %v2866_v37, %v2647_v42  ;;  %3501 = vrsqrt.f32 %v2623_v47 }
 0x681   : > { %2671 = vst.msk [vmem:[%s4111_s30 + $0x8] sm:$0xff] %vm677_vm0, %v2663_v20  ;;  %v2650_v58 = vmul.f32 %v2865_v26, %v2635_v9  ;;  %3503 = vrsqrt.f32 %v2622_v49 }
 0x682   : > { %v3496_v52 = vpop.eup %3495  ;;  %2670 = vst.msk [vmem:[%s4111_s30] sm:$0xff] %vm677_vm0, %v2662_v39 }
 0x683   : > { %v2665_v23 = vadd.f32 %v2866_v37, %v2650_v58  ;;  %v2634_v54 = vmul.f32 %v3496_v52, %v4073_v17 }
 0x685   : > { %2673 = vst.msk [vmem:[%s4111_s30 + $0x18] sm:$0xff] %vm677_vm0, %v2665_v23  ;;  %v2649_v59 = vmul.f32 %v2865_v26, %v2634_v54 }
 0x686   : > { %v3498_v40 = vpop.eup %3497 }
 0x687   : > { %v3500_v53 = vpop.eup %3499  ;;  %v2664_v45 = vadd.f32 %v2866_v37, %v2649_v59  ;;  %v2637_v60 = vmul.f32 %v3498_v40, %v4080_v15 }
 0x688   : > { %v2636_v50 = vmul.f32 %v3500_v53, %v4076_v44 }
 0x689   : > { %2672 = vst.msk [vmem:[%s4111_s30 + $0x10] sm:$0xff] %vm677_vm0, %v2664_v45  ;;  %v2652_v61 = vmul.f32 %v2865_v26, %v2637_v60 }
 0x68a   : > { %v3502_v51 = vpop.eup %3501  ;;  %v2651_v13 = vmul.f32 %v2865_v26, %v2636_v50 }
 0x68b   : > { %v3504_v17 = vpop.eup %3503  ;;  %v2667_v19 = vadd.f32 %v2866_v37, %v2652_v61  ;;  %v2639_v62 = vmul.f32 %v3502_v51, %v4089_v27 }
 0x68c   : > { %v2666_v25 = vadd.f32 %v2866_v37, %v2651_v13  ;;  %v2638_v63 = vmul.f32 %v3504_v17, %v4085_v21 }
 0x68d   : > { %2675 = vst.msk [vmem:[%s4111_s30 + $0x28] sm:$0xff] %vm677_vm0, %v2667_v19  ;;  %v2654_v32 = vmul.f32 %v2865_v26, %v2639_v62 }
 0x68e   : > { %2674 = vst.msk [vmem:[%s4111_s30 + $0x20] sm:$0xff] %vm677_vm0, %v2666_v25  ;;  %v2653_v44 = vmul.f32 %v2865_v26, %v2638_v63 }
 0x68f   : > { %v2669_v15 = vadd.f32 %v2866_v37, %v2654_v32 }
 0x690   : > { %v2668_v56 = vadd.f32 %v2866_v37, %v2653_v44 }
 0x691   : > { %2677 = vst.msk [vmem:[%s4111_s30 + $0x38] sm:$0xff] %vm677_vm0, %v2669_v15 }
 0x692   : > { %2676 = vst.msk [vmem:[%s4111_s30 + $0x30] sm:$0xff] %vm677_vm0, %v2668_v56 }
 0x693 PF: > { %s30_s1 = sadd.s32 1, %s3511_s1  }
 0x694   : > { %p27_p4 = scmp.ge.s32.totalorder %s30_s1, 4  }
 0x696   :  { %29 = sbr.rel (!%p27_p4) target bundleno = 6 (0x6), region = 133 }

</bundles_post_ra>
